<compile_context>
chip_gen: v7x
topology: tpu7x:2x2x1
jax: 0.10.0
libtpu: 0.0.40
codegen_flags: <defaults>
</compile_context>

<pallas_src>
import functools

import jax
import jax.numpy as jnp
from jax.experimental import pallas as pl
from jax.experimental.pallas import tpu as pltpu

_HIDDEN = 128
_ATOM_PAD = 128      # atoms padded to one full 128-lane group
_OUT_PAD = 128       # q output padded to one full 128-lane group (lane-dense store)
_NEG_LARGE = -1e30   # padded-atom bias -> exp(logit - max) underflows to exactly 0 in f32


def _network_kernel(out_dim,
                    x_ref, w1_ref, b1_ref, w2_ref, b2_ref,
                    w3_ref, b3_ref, sel_num_ref, sel_den_ref, pad_ref,
                    out_ref):
    # Shapes (per grid step):
    #   x_ref:   (TB, D)              w1_ref: (D, 128)        b1_ref: (1, 128)
    #   w2_ref:  (128, 128)           b2_ref: (1, 128)
    #   w3_ref:  (128, out_dim*128)   b3_ref: (1, out_dim*128)
    #   sel_num_ref / sel_den_ref: (out_dim*128, 128)   pad_ref: (1, 128)
    #   out_ref: (TB, 128)  -- q in lanes [0, out_dim), zeros elsewhere.
    x = x_ref[...]
    h1 = jnp.maximum(
        jnp.dot(x, w1_ref[...], preferred_element_type=jnp.float32)
        + b1_ref[...], 0.0)
    h2 = jnp.maximum(
        jnp.dot(h1, w2_ref[...], preferred_element_type=jnp.float32)
        + b2_ref[...], 0.0)

    tb = x.shape[0]
    num = jnp.zeros((tb, _OUT_PAD), jnp.float32)
    den = jnp.zeros((tb, _OUT_PAD), jnp.float32)

    # Static unroll over the (small) action count.  Per action:
    #   * one 128x128 MXU matmul for that action's padded atom logits,
    #   * EUP exp on that single 128-lane group (padded lanes -> exactly 0),
    #   * two block-diagonal selector matmuls that land sum(e * support) and
    #     sum(e) directly in output lane `a` of lane-dense accumulators
    #     (no XLU row reductions, no concatenation of width-1 columns).
    # The per-action structure lets action a's exp overlap action a+1's MXU push.
    for a in range(out_dim):
        lo = a * _ATOM_PAD
        hi = lo + _ATOM_PAD
        logits = (jnp.dot(h2, w3_ref[:, lo:hi],
                          preferred_element_type=jnp.float32)
                  + b3_ref[:, lo:hi])                        # (TB, 128)
        m = jnp.max(logits, axis=-1, keepdims=True)          # max over real atoms
        e = jnp.exp(logits - m)                               # padded lanes -> 0
        num = num + jnp.dot(e, sel_num_ref[lo:hi, :],
                            preferred_element_type=jnp.float32)
        den = den + jnp.dot(e, sel_den_ref[lo:hi, :],
                            preferred_element_type=jnp.float32)

    # pad_ref is 1.0 in lanes >= out_dim (where den == 0) so the reciprocal stays
    # finite; num is 0 there, so those lanes store exact zeros.
    q = num * pl.reciprocal(den + pad_ref[...], approx=True)
    out_ref[...] = q                                          # one lane-dense store


def prepare_params(w1, b1, w2, b2, w3, b3, support, out_dim, atom_size):
    """One-time (init-time) reshape/pad of parameters. Not on the forward path."""
    H = w1.shape[1]
    # W3: (H, out_dim*atom_size) -> atom axis padded to _ATOM_PAD, re-flattened.
    w3_3d = w3.reshape(H, out_dim, atom_size)
    w3_pad = jnp.zeros((H, out_dim, _ATOM_PAD), jnp.float32)
    w3_pad = w3_pad.at[:, :, :atom_size].set(w3_3d)
    w3_pad = w3_pad.reshape(H, out_dim * _ATOM_PAD)
    # b3: padded atoms get a huge negative bias so exp() zeroes them out.
    b3_2d = b3.reshape(out_dim, atom_size)
    b3_pad = jnp.full((out_dim, _ATOM_PAD), _NEG_LARGE, jnp.float32)
    b3_pad = b3_pad.at[:, :atom_size].set(b3_2d)
    b3_pad = b3_pad.reshape(1, out_dim * _ATOM_PAD)
    # Block-diagonal selectors: row block a maps action a's atom lanes onto output
    # lane a.  sel_num carries the support values (folds e*support into the MXU),
    # sel_den carries ones.  Padded atom rows stay zero.
    sel_num = jnp.zeros((out_dim * _ATOM_PAD, _OUT_PAD), jnp.float32)
    sel_den = jnp.zeros((out_dim * _ATOM_PAD, _OUT_PAD), jnp.float32)
    for a in range(out_dim):
        rows = a * _ATOM_PAD + jnp.arange(atom_size)
        sel_num = sel_num.at[rows, a].set(support)
        sel_den = sel_den.at[rows, a].set(1.0)
    # 1.0 in padded output lanes keeps the reciprocal finite there.
    pad_ind = jnp.zeros((1, _OUT_PAD), jnp.float32).at[0, out_dim:].set(1.0)
    return (w1, b1.reshape(1, H), w2, b2.reshape(1, H),
            w3_pad, b3_pad, sel_num, sel_den, pad_ind)


def network_forward(x, params, out_dim):
    """x: (B, input_dim) f32, params from prepare_params -> (B, out_dim) f32."""
    w1, b1, w2, b2, w3p, b3p, sel_num, sel_den, pad_ind = params
    B, D = x.shape
    H = w1.shape[1]
    N3 = w3p.shape[1]

    # Batch tile: multiple of 8 sublanes.  For B >= 16 ensure at least two grid
    # steps (so both v7x TensorCores get work under "parallel"); large batches use
    # 512-row tiles to amortize the ~0.35us/step grid overhead.
    if B >= 16:
        TB = min(512, ((B + 1) // 2 + 7) // 8 * 8)
    else:
        TB = max(8, ((B + 7) // 8) * 8)
    B_pad = ((B + TB - 1) // TB) * TB
    if B_pad != B:
        x = jnp.pad(x, ((0, B_pad - B), (0, 0)))

    out = pl.pallas_call(
        functools.partial(_network_kernel, out_dim),
        out_shape=jax.ShapeDtypeStruct((B_pad, _OUT_PAD), jnp.float32),
        grid=(B_pad // TB,),
        in_specs=[
            pl.BlockSpec((TB, D), lambda i: (i, 0)),
            pl.BlockSpec((D, H), lambda i: (0, 0)),
            pl.BlockSpec((1, H), lambda i: (0, 0)),
            pl.BlockSpec((H, H), lambda i: (0, 0)),
            pl.BlockSpec((1, H), lambda i: (0, 0)),
            pl.BlockSpec((H, N3), lambda i: (0, 0)),
            pl.BlockSpec((1, N3), lambda i: (0, 0)),
            pl.BlockSpec((N3, _OUT_PAD), lambda i: (0, 0)),
            pl.BlockSpec((N3, _OUT_PAD), lambda i: (0, 0)),
            pl.BlockSpec((1, _OUT_PAD), lambda i: (0, 0)),
        ],
        out_specs=pl.BlockSpec((TB, _OUT_PAD), lambda i: (i, 0)),
        compiler_params=pltpu.CompilerParams(
            dimension_semantics=("parallel",)),
    )(x, w1, b1, w2, b2, w3p, b3p, sel_num, sel_den, pad_ind)
    # Lane-dense (B_pad, 128) result; slice back to the logical (B, out_dim).
    return out[:B, :out_dim]


def _xavier_uniform(key, fan_in, fan_out):
    bound = (6.0 / (fan_in + fan_out)) ** 0.5
    return jax.random.uniform(key, (fan_in, fan_out), jnp.float32,
                              -bound, bound)


def _reference(x, w1, b1, w2, b2, w3, b3, support, out_dim, atom_size):
    h1 = jax.nn.relu(x @ w1 + b1)
    h2 = jax.nn.relu(h1 @ w2 + b2)
    o = (h2 @ w3 + b3).reshape(-1, out_dim, atom_size)
    dist = jax.nn.softmax(o, axis=2)
    return jnp.sum(dist * support, axis=2)


if __name__ == "__main__":
    # Small, module-consistent shapes.
    B, INPUT_DIM, OUT_DIM, ATOM_SIZE, HIDDEN = 4, 16, 4, 51, 128

    key = jax.random.PRNGKey(0)
    kx, k1, k2, k3 = jax.random.split(key, 4)

    x = jax.random.normal(kx, (B, INPUT_DIM), jnp.float32)

    # Deterministic xavier-uniform weights, zero biases (as in _initialize).
    w1 = _xavier_uniform(k1, INPUT_DIM, HIDDEN)
    b1 = jnp.zeros((HIDDEN,), jnp.float32)
    w2 = _xavier_uniform(k2, HIDDEN, HIDDEN)
    b2 = jnp.zeros((HIDDEN,), jnp.float32)
    w3 = _xavier_uniform(k3, HIDDEN, OUT_DIM * ATOM_SIZE)
    b3 = jnp.zeros((OUT_DIM * ATOM_SIZE,), jnp.float32)

    support = jnp.linspace(-10.0, 10.0, ATOM_SIZE, dtype=jnp.float32)

    # One-time parameter prep (hoisted out of the forward path).
    params = prepare_params(w1, b1, w2, b2, w3, b3, support,
                            OUT_DIM, ATOM_SIZE)

    out = network_forward(x, params, OUT_DIM)
    out = jax.block_until_ready(out)

    ref = _reference(x, w1, b1, w2, b2, w3, b3, support, OUT_DIM, ATOM_SIZE)
    assert out.shape == (B, OUT_DIM)
    # Tolerance accommodates the EUP approximate reciprocal (~2^-12 rel error);
    # |q| <= 10 so the induced absolute error is well under 5e-3.
    assert jnp.allclose(out, ref, atol=5e-3, rtol=1e-3), (out, ref)

    print("KERNEL_OK")
</pallas_src>

<mosaic_0001>
module attributes {stable_mosaic.version = 11 : i64} {
  func.func @_network_kernel(%arg0: i32, %arg1: memref<8x16xf32, #tpu.memory_space<vmem>>, %arg2: memref<16x128xf32, #tpu.memory_space<vmem>>, %arg3: memref<1x128xf32, #tpu.memory_space<vmem>>, %arg4: memref<128x128xf32, #tpu.memory_space<vmem>>, %arg5: memref<1x128xf32, #tpu.memory_space<vmem>>, %arg6: memref<128x512xf32, #tpu.memory_space<vmem>>, %arg7: memref<1x512xf32, #tpu.memory_space<vmem>>, %arg8: memref<512x128xf32, #tpu.memory_space<vmem>>, %arg9: memref<512x128xf32, #tpu.memory_space<vmem>>, %arg10: memref<1x128xf32, #tpu.memory_space<vmem>>, %arg11: memref<8x128xf32, #tpu.memory_space<vmem>>) attributes {dimension_semantics = [#tpu.dimension_semantics<parallel>], iteration_bounds = array<i64: 1>, scalar_prefetch = 0 : i64, scratch_operands = 0 : i64, tpu.core_type = #tpu.core_type<tc>, window_params = [{transform_indices = @transform_0, window_bounds = array<i64: 8, 16>}, {pipeline_mode = #tpu.pipeline_mode<synchronous>, transform_indices = @transform_1, window_bounds = array<i64: 16, 128>}, {pipeline_mode = #tpu.pipeline_mode<synchronous>, transform_indices = @transform_2, window_bounds = array<i64: 1, 128>}, {pipeline_mode = #tpu.pipeline_mode<synchronous>, transform_indices = @transform_3, window_bounds = array<i64: 128, 128>}, {pipeline_mode = #tpu.pipeline_mode<synchronous>, transform_indices = @transform_4, window_bounds = array<i64: 1, 128>}, {pipeline_mode = #tpu.pipeline_mode<synchronous>, transform_indices = @transform_5, window_bounds = array<i64: 128, 512>}, {pipeline_mode = #tpu.pipeline_mode<synchronous>, transform_indices = @transform_6, window_bounds = array<i64: 1, 512>}, {pipeline_mode = #tpu.pipeline_mode<synchronous>, transform_indices = @transform_7, window_bounds = array<i64: 512, 128>}, {pipeline_mode = #tpu.pipeline_mode<synchronous>, transform_indices = @transform_8, window_bounds = array<i64: 512, 128>}, {pipeline_mode = #tpu.pipeline_mode<synchronous>, transform_indices = @transform_9, window_bounds = array<i64: 1, 128>}, {transform_indices = @transform_10, window_bounds = array<i64: 8, 128>}]} {
    %c0 = arith.constant 0 : index
    %c0_0 = arith.constant 0 : index
    %0 = vector.load %arg1[%c0, %c0_0] : memref<8x16xf32, #tpu.memory_space<vmem>>, vector<8x16xf32>
    %c0_1 = arith.constant 0 : index
    %c0_2 = arith.constant 0 : index
    %1 = vector.load %arg2[%c0_1, %c0_2] : memref<16x128xf32, #tpu.memory_space<vmem>>, vector<16x128xf32>
    %cst = arith.constant dense<0.000000e+00> : vector<8x128xf32>
    %2 = tpu.matmul %0, %1, %cst {dimension_numbers = #tpu.dot_dimension_numbers<[1], [0], [0], [1], [0, 0, 1, 1], [], []>} : vector<8x16xf32>, vector<16x128xf32>, vector<8x128xf32> -> vector<8x128xf32>
    %c0_3 = arith.constant 0 : index
    %c0_4 = arith.constant 0 : index
    %3 = vector.load %arg3[%c0_3, %c0_4] : memref<1x128xf32, #tpu.memory_space<vmem>>, vector<1x128xf32>
    %4 = vector.broadcast %3 : vector<1x128xf32> to vector<8x128xf32>
    %5 = arith.addf %2, %4 : vector<8x128xf32>
    %cst_5 = arith.constant 0.000000e+00 : f32
    %6 = vector.broadcast %cst_5 : f32 to vector<8x128xf32>
    %7 = arith.maximumf %5, %6 : vector<8x128xf32>
    %c0_6 = arith.constant 0 : index
    %c0_7 = arith.constant 0 : index
    %8 = vector.load %arg4[%c0_6, %c0_7] : memref<128x128xf32, #tpu.memory_space<vmem>>, vector<128x128xf32>
    %cst_8 = arith.constant dense<0.000000e+00> : vector<8x128xf32>
    %9 = tpu.matmul %7, %8, %cst_8 {dimension_numbers = #tpu.dot_dimension_numbers<[1], [0], [0], [1], [0, 0, 1, 1], [], []>} : vector<8x128xf32>, vector<128x128xf32>, vector<8x128xf32> -> vector<8x128xf32>
    %c0_9 = arith.constant 0 : index
    %c0_10 = arith.constant 0 : index
    %10 = vector.load %arg5[%c0_9, %c0_10] : memref<1x128xf32, #tpu.memory_space<vmem>>, vector<1x128xf32>
    %11 = vector.broadcast %10 : vector<1x128xf32> to vector<8x128xf32>
    %12 = arith.addf %9, %11 : vector<8x128xf32>
    %cst_11 = arith.constant 0.000000e+00 : f32
    %13 = vector.broadcast %cst_11 : f32 to vector<8x128xf32>
    %14 = arith.maximumf %12, %13 : vector<8x128xf32>
    %cst_12 = arith.constant 0.000000e+00 : f32
    %15 = vector.broadcast %cst_12 : f32 to vector<8x128xf32>
    %cst_13 = arith.constant 0.000000e+00 : f32
    %16 = vector.broadcast %cst_13 : f32 to vector<8x128xf32>
    %c0_14 = arith.constant 0 : index
    %c0_15 = arith.constant 0 : index
    %17 = vector.load %arg6[%c0_14, %c0_15] : memref<128x512xf32, #tpu.memory_space<vmem>>, vector<128x128xf32>
    %cst_16 = arith.constant dense<0.000000e+00> : vector<8x128xf32>
    %18 = tpu.matmul %14, %17, %cst_16 {dimension_numbers = #tpu.dot_dimension_numbers<[1], [0], [0], [1], [0, 0, 1, 1], [], []>} : vector<8x128xf32>, vector<128x128xf32>, vector<8x128xf32> -> vector<8x128xf32>
    %c0_17 = arith.constant 0 : index
    %c0_18 = arith.constant 0 : index
    %19 = vector.load %arg7[%c0_17, %c0_18] : memref<1x512xf32, #tpu.memory_space<vmem>>, vector<1x128xf32>
    %20 = vector.broadcast %19 : vector<1x128xf32> to vector<8x128xf32>
    %21 = arith.addf %18, %20 : vector<8x128xf32>
    %cst_19 = arith.constant dense<0xFF800000> : vector<8xf32>
    %22 = vector.multi_reduction <maximumf>, %21, %cst_19 [1] : vector<8x128xf32> to vector<8xf32>
    %23 = vector.shape_cast %22 : vector<8xf32> to vector<8x1xf32>
    %24 = vector.broadcast %23 : vector<8x1xf32> to vector<8x128xf32>
    %25 = arith.subf %21, %24 : vector<8x128xf32>
    %26 = math.exp %25 : vector<8x128xf32>
    %c0_20 = arith.constant 0 : index
    %c0_21 = arith.constant 0 : index
    %27 = vector.load %arg8[%c0_20, %c0_21] : memref<512x128xf32, #tpu.memory_space<vmem>>, vector<128x128xf32>
    %cst_22 = arith.constant dense<0.000000e+00> : vector<8x128xf32>
    %28 = tpu.matmul %26, %27, %cst_22 {dimension_numbers = #tpu.dot_dimension_numbers<[1], [0], [0], [1], [0, 0, 1, 1], [], []>} : vector<8x128xf32>, vector<128x128xf32>, vector<8x128xf32> -> vector<8x128xf32>
    %29 = arith.addf %15, %28 : vector<8x128xf32>
    %c0_23 = arith.constant 0 : index
    %c0_24 = arith.constant 0 : index
    %30 = vector.load %arg9[%c0_23, %c0_24] : memref<512x128xf32, #tpu.memory_space<vmem>>, vector<128x128xf32>
    %cst_25 = arith.constant dense<0.000000e+00> : vector<8x128xf32>
    %31 = tpu.matmul %26, %30, %cst_25 {dimension_numbers = #tpu.dot_dimension_numbers<[1], [0], [0], [1], [0, 0, 1, 1], [], []>} : vector<8x128xf32>, vector<128x128xf32>, vector<8x128xf32> -> vector<8x128xf32>
    %32 = arith.addf %16, %31 : vector<8x128xf32>
    %c0_26 = arith.constant 0 : index
    %c128 = arith.constant 128 : index
    %33 = vector.load %arg6[%c0_26, %c128] : memref<128x512xf32, #tpu.memory_space<vmem>>, vector<128x128xf32>
    %cst_27 = arith.constant dense<0.000000e+00> : vector<8x128xf32>
    %34 = tpu.matmul %14, %33, %cst_27 {dimension_numbers = #tpu.dot_dimension_numbers<[1], [0], [0], [1], [0, 0, 1, 1], [], []>} : vector<8x128xf32>, vector<128x128xf32>, vector<8x128xf32> -> vector<8x128xf32>
    %c0_28 = arith.constant 0 : index
    %c128_29 = arith.constant 128 : index
    %35 = vector.load %arg7[%c0_28, %c128_29] : memref<1x512xf32, #tpu.memory_space<vmem>>, vector<1x128xf32>
    %36 = vector.broadcast %35 : vector<1x128xf32> to vector<8x128xf32>
    %37 = arith.addf %34, %36 : vector<8x128xf32>
    %cst_30 = arith.constant dense<0xFF800000> : vector<8xf32>
    %38 = vector.multi_reduction <maximumf>, %37, %cst_30 [1] : vector<8x128xf32> to vector<8xf32>
    %39 = vector.shape_cast %38 : vector<8xf32> to vector<8x1xf32>
    %40 = vector.broadcast %39 : vector<8x1xf32> to vector<8x128xf32>
    %41 = arith.subf %37, %40 : vector<8x128xf32>
    %42 = math.exp %41 : vector<8x128xf32>
    %c128_31 = arith.constant 128 : index
    %c0_32 = arith.constant 0 : index
    %43 = vector.load %arg8[%c128_31, %c0_32] : memref<512x128xf32, #tpu.memory_space<vmem>>, vector<128x128xf32>
    %cst_33 = arith.constant dense<0.000000e+00> : vector<8x128xf32>
    %44 = tpu.matmul %42, %43, %cst_33 {dimension_numbers = #tpu.dot_dimension_numbers<[1], [0], [0], [1], [0, 0, 1, 1], [], []>} : vector<8x128xf32>, vector<128x128xf32>, vector<8x128xf32> -> vector<8x128xf32>
    %45 = arith.addf %29, %44 : vector<8x128xf32>
    %c128_34 = arith.constant 128 : index
    %c0_35 = arith.constant 0 : index
    %46 = vector.load %arg9[%c128_34, %c0_35] : memref<512x128xf32, #tpu.memory_space<vmem>>, vector<128x128xf32>
    %cst_36 = arith.constant dense<0.000000e+00> : vector<8x128xf32>
    %47 = tpu.matmul %42, %46, %cst_36 {dimension_numbers = #tpu.dot_dimension_numbers<[1], [0], [0], [1], [0, 0, 1, 1], [], []>} : vector<8x128xf32>, vector<128x128xf32>, vector<8x128xf32> -> vector<8x128xf32>
    %48 = arith.addf %32, %47 : vector<8x128xf32>
    %c0_37 = arith.constant 0 : index
    %c256 = arith.constant 256 : index
    %49 = vector.load %arg6[%c0_37, %c256] : memref<128x512xf32, #tpu.memory_space<vmem>>, vector<128x128xf32>
    %cst_38 = arith.constant dense<0.000000e+00> : vector<8x128xf32>
    %50 = tpu.matmul %14, %49, %cst_38 {dimension_numbers = #tpu.dot_dimension_numbers<[1], [0], [0], [1], [0, 0, 1, 1], [], []>} : vector<8x128xf32>, vector<128x128xf32>, vector<8x128xf32> -> vector<8x128xf32>
    %c0_39 = arith.constant 0 : index
    %c256_40 = arith.constant 256 : index
    %51 = vector.load %arg7[%c0_39, %c256_40] : memref<1x512xf32, #tpu.memory_space<vmem>>, vector<1x128xf32>
    %52 = vector.broadcast %51 : vector<1x128xf32> to vector<8x128xf32>
    %53 = arith.addf %50, %52 : vector<8x128xf32>
    %cst_41 = arith.constant dense<0xFF800000> : vector<8xf32>
    %54 = vector.multi_reduction <maximumf>, %53, %cst_41 [1] : vector<8x128xf32> to vector<8xf32>
    %55 = vector.shape_cast %54 : vector<8xf32> to vector<8x1xf32>
    %56 = vector.broadcast %55 : vector<8x1xf32> to vector<8x128xf32>
    %57 = arith.subf %53, %56 : vector<8x128xf32>
    %58 = math.exp %57 : vector<8x128xf32>
    %c256_42 = arith.constant 256 : index
    %c0_43 = arith.constant 0 : index
    %59 = vector.load %arg8[%c256_42, %c0_43] : memref<512x128xf32, #tpu.memory_space<vmem>>, vector<128x128xf32>
    %cst_44 = arith.constant dense<0.000000e+00> : vector<8x128xf32>
    %60 = tpu.matmul %58, %59, %cst_44 {dimension_numbers = #tpu.dot_dimension_numbers<[1], [0], [0], [1], [0, 0, 1, 1], [], []>} : vector<8x128xf32>, vector<128x128xf32>, vector<8x128xf32> -> vector<8x128xf32>
    %61 = arith.addf %45, %60 : vector<8x128xf32>
    %c256_45 = arith.constant 256 : index
    %c0_46 = arith.constant 0 : index
    %62 = vector.load %arg9[%c256_45, %c0_46] : memref<512x128xf32, #tpu.memory_space<vmem>>, vector<128x128xf32>
    %cst_47 = arith.constant dense<0.000000e+00> : vector<8x128xf32>
    %63 = tpu.matmul %58, %62, %cst_47 {dimension_numbers = #tpu.dot_dimension_numbers<[1], [0], [0], [1], [0, 0, 1, 1], [], []>} : vector<8x128xf32>, vector<128x128xf32>, vector<8x128xf32> -> vector<8x128xf32>
    %64 = arith.addf %48, %63 : vector<8x128xf32>
    %c0_48 = arith.constant 0 : index
    %c384 = arith.constant 384 : index
    %65 = vector.load %arg6[%c0_48, %c384] : memref<128x512xf32, #tpu.memory_space<vmem>>, vector<128x128xf32>
    %cst_49 = arith.constant dense<0.000000e+00> : vector<8x128xf32>
    %66 = tpu.matmul %14, %65, %cst_49 {dimension_numbers = #tpu.dot_dimension_numbers<[1], [0], [0], [1], [0, 0, 1, 1], [], []>} : vector<8x128xf32>, vector<128x128xf32>, vector<8x128xf32> -> vector<8x128xf32>
    %c0_50 = arith.constant 0 : index
    %c384_51 = arith.constant 384 : index
    %67 = vector.load %arg7[%c0_50, %c384_51] : memref<1x512xf32, #tpu.memory_space<vmem>>, vector<1x128xf32>
    %68 = vector.broadcast %67 : vector<1x128xf32> to vector<8x128xf32>
    %69 = arith.addf %66, %68 : vector<8x128xf32>
    %cst_52 = arith.constant dense<0xFF800000> : vector<8xf32>
    %70 = vector.multi_reduction <maximumf>, %69, %cst_52 [1] : vector<8x128xf32> to vector<8xf32>
    %71 = vector.shape_cast %70 : vector<8xf32> to vector<8x1xf32>
    %72 = vector.broadcast %71 : vector<8x1xf32> to vector<8x128xf32>
    %73 = arith.subf %69, %72 : vector<8x128xf32>
    %74 = math.exp %73 : vector<8x128xf32>
    %c384_53 = arith.constant 384 : index
    %c0_54 = arith.constant 0 : index
    %75 = vector.load %arg8[%c384_53, %c0_54] : memref<512x128xf32, #tpu.memory_space<vmem>>, vector<128x128xf32>
    %cst_55 = arith.constant dense<0.000000e+00> : vector<8x128xf32>
    %76 = tpu.matmul %74, %75, %cst_55 {dimension_numbers = #tpu.dot_dimension_numbers<[1], [0], [0], [1], [0, 0, 1, 1], [], []>} : vector<8x128xf32>, vector<128x128xf32>, vector<8x128xf32> -> vector<8x128xf32>
    %77 = arith.addf %61, %76 : vector<8x128xf32>
    %c384_56 = arith.constant 384 : index
    %c0_57 = arith.constant 0 : index
    %78 = vector.load %arg9[%c384_56, %c0_57] : memref<512x128xf32, #tpu.memory_space<vmem>>, vector<128x128xf32>
    %cst_58 = arith.constant dense<0.000000e+00> : vector<8x128xf32>
    %79 = tpu.matmul %74, %78, %cst_58 {dimension_numbers = #tpu.dot_dimension_numbers<[1], [0], [0], [1], [0, 0, 1, 1], [], []>} : vector<8x128xf32>, vector<128x128xf32>, vector<8x128xf32> -> vector<8x128xf32>
    %80 = arith.addf %64, %79 : vector<8x128xf32>
    %c0_59 = arith.constant 0 : index
    %c0_60 = arith.constant 0 : index
    %81 = vector.load %arg10[%c0_59, %c0_60] : memref<1x128xf32, #tpu.memory_space<vmem>>, vector<1x128xf32>
    %82 = vector.broadcast %81 : vector<1x128xf32> to vector<8x128xf32>
    %83 = arith.addf %80, %82 : vector<8x128xf32>
    %84 = tpu.reciprocal %83 {approx = true} : vector<8x128xf32> -> vector<8x128xf32>
    %85 = arith.mulf %77, %84 : vector<8x128xf32>
    %c0_61 = arith.constant 0 : index
    %c0_62 = arith.constant 0 : index
    %86 = vector.load %arg11[%c0_61, %c0_62] : memref<8x128xf32, #tpu.memory_space<vmem>>, vector<8x128xf32>
    tpu.vector_store %arg11[%c0_61, %c0_62], %85 {strides = array<i32>} : memref<8x128xf32, #tpu.memory_space<vmem>>, vector<8x128xf32>,
    return
  }
  func.func @transform_0(%arg0: i32) -> (i32, i32) {
    %c0_i32 = arith.constant 0 : i32
    %c0_i32_0 = arith.constant 0 : i32
    return %arg0, %c0_i32 : i32, i32
  }
  func.func @transform_1(%arg0: i32) -> (i32, i32) {
    %c0_i32 = arith.constant 0 : i32
    %c0_i32_0 = arith.constant 0 : i32
    %c0_i32_1 = arith.constant 0 : i32
    return %c0_i32, %c0_i32_0 : i32, i32
  }
  func.func @transform_2(%arg0: i32) -> (i32, i32) {
    %c0_i32 = arith.constant 0 : i32
    %c0_i32_0 = arith.constant 0 : i32
    %c0_i32_1 = arith.constant 0 : i32
    return %c0_i32, %c0_i32_0 : i32, i32
  }
  func.func @transform_3(%arg0: i32) -> (i32, i32) {
    %c0_i32 = arith.constant 0 : i32
    %c0_i32_0 = arith.constant 0 : i32
    %c0_i32_1 = arith.constant 0 : i32
    return %c0_i32, %c0_i32_0 : i32, i32
  }
  func.func @transform_4(%arg0: i32) -> (i32, i32) {
    %c0_i32 = arith.constant 0 : i32
    %c0_i32_0 = arith.constant 0 : i32
    %c0_i32_1 = arith.constant 0 : i32
    return %c0_i32, %c0_i32_0 : i32, i32
  }
  func.func @transform_5(%arg0: i32) -> (i32, i32) {
    %c0_i32 = arith.constant 0 : i32
    %c0_i32_0 = arith.constant 0 : i32
    %c0_i32_1 = arith.constant 0 : i32
    return %c0_i32, %c0_i32_0 : i32, i32
  }
  func.func @transform_6(%arg0: i32) -> (i32, i32) {
    %c0_i32 = arith.constant 0 : i32
    %c0_i32_0 = arith.constant 0 : i32
    %c0_i32_1 = arith.constant 0 : i32
    return %c0_i32, %c0_i32_0 : i32, i32
  }
  func.func @transform_7(%arg0: i32) -> (i32, i32) {
    %c0_i32 = arith.constant 0 : i32
    %c0_i32_0 = arith.constant 0 : i32
    %c0_i32_1 = arith.constant 0 : i32
    return %c0_i32, %c0_i32_0 : i32, i32
  }
  func.func @transform_8(%arg0: i32) -> (i32, i32) {
    %c0_i32 = arith.constant 0 : i32
    %c0_i32_0 = arith.constant 0 : i32
    %c0_i32_1 = arith.constant 0 : i32
    return %c0_i32, %c0_i32_0 : i32, i32
  }
  func.func @transform_9(%arg0: i32) -> (i32, i32) {
    %c0_i32 = arith.constant 0 : i32
    %c0_i32_0 = arith.constant 0 : i32
    %c0_i32_1 = arith.constant 0 : i32
    return %c0_i32, %c0_i32_0 : i32, i32
  }
  func.func @transform_10(%arg0: i32) -> (i32, i32) {
    %c0_i32 = arith.constant 0 : i32
    %c0_i32_0 = arith.constant 0 : i32
    return %arg0, %c0_i32 : i32, i32
  }
}

</mosaic_0001>

<bundles_post_ra>
// kernel: tpu_custom_call.1
= control target key start
LH: loop header
LB: loop body
LE: loop exit
PB: predicated region body
PF: predicated region fallthrough
CT: control target
= control target key end

     0   :  { %15 = vsyncpa [#allocation3], 0  ;;  %s2957_s0 = inlined_call_operand.hbm [shape: f32[8,16], index: 0, kind: input, shape index: {}]   ;;  %s2958_s1 = inlined_call_operand.hbm [shape: f32[16,128], index: 1, kind: input, shape index: {}]   ;;  %s2959_s2 = inlined_call_operand.vmem [shape: f32[1,128], index: 2, kind: input, shape index: {}]   ;;  %s2960_s3 = inlined_call_operand.hbm [shape: f32[128,128], index: 3, kind: input, shape index: {}]   ;;  %s2961_s4 = inlined_call_operand.vmem [shape: f32[1,128], index: 4, kind: input, shape index: {}]   ;;  %s2962_s5 = inlined_call_operand.hbm [shape: f32[128,512], index: 5, kind: input, shape index: {}]   ;;  %s2963_s6 = inlined_call_operand.vmem [shape: f32[1,512], index: 6, kind: input, shape index: {}]   ;;  %s2964_s7 = inlined_call_operand.hbm [shape: f32[512,128], index: 7, kind: input, shape index: {}]   ;;  %s2965_s8 = inlined_call_operand.hbm [shape: f32[512,128], index: 8, kind: input, shape index: {}]   ;;  %s2966_s9 = inlined_call_operand.vmem [shape: f32[1,128], index: 9, kind: input, shape index: {}]   ;;  %s2967_s10 = inlined_call_operand.hbm [shape: f32[8,128], index: 10, kind: output, shape index: {}]  }
   0x1   :  { %16 = vsyncpa [#allocation6], 0 }
   0x2   :  { %17 = vsyncpa [#allocation9], 0 }
   0x3   :  { %18 = vsyncpa [#allocation12], 0 }
   0x4   :  { %19 = vsyncpa [#allocation4], 0  ;;  %s2611_s13 = smov [#allocation5]   ;;  %s2447_s17 = scalar_lea.hbm %s2958_s1, 256 }
   0x5   :  { %s35_s14 = sshll.u32 %s2611_s13, 4  ;;  %p2448_p0 = scmp.ne.s32.totalorder %s2958_s1, %s2447_s17  ;;  %s36_s14 = int_to_ptr.vmem [resolvable:$true] %s35_s14 }
   0x6   :  { %p2451_p1 = scmp.lt.u32.totalorder %s2447_s17, %s2958_s1 }
   0x8   :  { %p2453_p2 = pnand %p2451_p1, %p2448_p0 }
   0xa   :  { %2456 = shalt.err (!%p2453_p2)
}
   0xb   :  { %s2457_s22 = scalar_lea.vmem %s36_s14, 256  ;;  %p2462_p4 = scmp.lt.s32.totalorder %s36_s14, %s36_s14 }
   0xc   :  { %p2458_p3 = scmp.ne.s32.totalorder %s36_s14, %s2457_s22  ;;  %p2463_p5 = scmp.lt.s32.totalorder %s2457_s22, %s2457_s22 }
   0xe   :  { %p2464_p6 = por %p2463_p5, %p2462_p4 }
  0x10   :  { %p2465_p7 = pnand %p2464_p6, %p2458_p3 }
  0x12   :  { %2468 = shalt.err (!%p2465_p7)
}
  0x13   :  { %s2612_s23 = smov 128   ;;  %s2613_s24 = smov 8  }
  0x14   :  { %41 = dma.hbm_to_vmem [thread:$0]  %s2958_s1, 256, %s36_s14, [#allocation6], %s2612_s23, %s2612_s23, %s2613_s24  }
  0x15   :  { %s2614_s27 = smov [#allocation8]   ;;  %s2469_s11 = scalar_lea.hbm %s2962_s5, 8192 }
  0x16   :  { %s63_s28 = sshll.u32 %s2614_s27, 4  ;;  %p2470_p8 = scmp.ne.s32.totalorder %s2962_s5, %s2469_s11  ;;  %s64_s28 = int_to_ptr.vmem [resolvable:$true] %s63_s28 }
  0x17   :  { %p2473_p9 = scmp.lt.u32.totalorder %s2469_s11, %s2962_s5 }
  0x19   :  { %p2475_p10 = pnand %p2473_p9, %p2470_p8 }
  0x1b   :  { %2478 = shalt.err (!%p2475_p10)
}
  0x1c   :  { %s2479_s17 = scalar_lea.vmem %s64_s28, 8192  ;;  %p2484_p12 = scmp.lt.s32.totalorder %s64_s28, %s64_s28 }
  0x1d   :  { %p2480_p11 = scmp.ne.s32.totalorder %s64_s28, %s2479_s17  ;;  %p2485_p13 = scmp.lt.s32.totalorder %s2479_s17, %s2479_s17 }
  0x1f   :  { %p2486_p0 = por %p2485_p13, %p2484_p12 }
  0x21   :  { %p2487_p1 = pnand %p2486_p0, %p2480_p11 }
  0x23   :  { %2490 = shalt.err (!%p2487_p1)
}
  0x24   :  { %s2615_s1 = smov 512   ;;  %s2616_s14 = smov 32  }
  0x25   :  { %69 = dma.hbm_to_vmem [thread:$0]  %s2962_s5, 8192, %s64_s28, [#allocation9], %s2615_s1, %s2615_s1, %s2616_s14  }
  0x26   :  { %s2617_s20 = smov [#allocation2]   ;;  %s2618_s22 = smov [#allocation7]  }
  0x27   :  { %s26_s21 = sshll.u32 %s2617_s20, 4  ;;  %s49_s25 = sshll.u32 %s2618_s22, 4  ;;  %s27_s21 = int_to_ptr.vmem [resolvable:$true] %s26_s21  ;;  %s2707_s25 = int_to_ptr.vmem [resolvable:$true] %s49_s25 }
  0x28   :  { %s2491_s29 = scalar_lea.hbm %s2957_s0, 128 }
  0x29   :  { %p2492_p2 = scmp.ne.s32.totalorder %s2957_s0, %s2491_s29  ;;  %p2495_p3 = scmp.lt.u32.totalorder %s2491_s29, %s2957_s0 }
  0x2b   :  { %p2497_p4 = pnand %p2495_p3, %p2492_p2 }
  0x2d   :  { %2500 = shalt.err (!%p2497_p4)
}
  0x2e   :  { %s2501_s5 = scalar_lea.vmem %s27_s21, 128  ;;  %p2506_p6 = scmp.lt.s32.totalorder %s27_s21, %s27_s21 }
  0x2f   :  { %p2502_p5 = scmp.ne.s32.totalorder %s27_s21, %s2501_s5  ;;  %p2507_p7 = scmp.lt.s32.totalorder %s2501_s5, %s2501_s5 }
  0x31   :  { %p2508_p8 = por %p2507_p7, %p2506_p6 }
  0x33   :  { %p2509_p9 = pnand %p2508_p8, %p2502_p5 }
  0x35   :  { %2512 = shalt.err (!%p2509_p9)
}
  0x36   :  { %29 = dma.hbm_to_vmem [thread:$0]  %s2957_s0, 128, %s27_s21, [#allocation3]  }
  0x37   :  { %s2513_s1 = scalar_lea.hbm %s2960_s3, 2048 }
  0x38   :  { %p2514_p10 = scmp.ne.s32.totalorder %s2960_s3, %s2513_s1  ;;  %p2517_p11 = scmp.lt.u32.totalorder %s2513_s1, %s2960_s3 }
  0x3a   :  { %p2519_p12 = pnand %p2517_p11, %p2514_p10 }
  0x3c   :  { %2522 = shalt.err (!%p2519_p12)
}
  0x3d   :  { %s2523_s22 = scalar_lea.vmem %s2707_s25, 2048  ;;  %p2528_p0 = scmp.lt.s32.totalorder %s2707_s25, %s2707_s25 }
  0x3e   :  { %p2524_p13 = scmp.ne.s32.totalorder %s2707_s25, %s2523_s22  ;;  %p2529_p1 = scmp.lt.s32.totalorder %s2523_s22, %s2523_s22 }
  0x40   :  { %p2530_p2 = por %p2529_p1, %p2528_p0 }
  0x42   :  { %p2531_p3 = pnand %p2530_p2, %p2524_p13 }
  0x44   :  { %2534 = shalt.err (!%p2531_p3)
}
  0x45   :  { %55 = dma.hbm_to_vmem [thread:$0]  %s2960_s3, 2048, %s2707_s25, [#allocation6], %s2612_s23, %s2612_s23, %s2613_s24  }
  0x46   :  { %s2619_s26 = smov [#allocation10]   ;;  %s2620_s29 = smov [#allocation11]  }
  0x47   :  { %s77_s27 = sshll.u32 %s2619_s26, 4  ;;  %s89_s30 = sshll.u32 %s2620_s29, 4  ;;  %s78_s27 = int_to_ptr.vmem [resolvable:$true] %s77_s27  ;;  %s2741_s30 = int_to_ptr.vmem [resolvable:$true] %s89_s30 }
  0x48   :  { %s2535_s13 = scalar_lea.hbm %s2964_s7, 8192 }
  0x49   :  { %p2536_p4 = scmp.ne.s32.totalorder %s2964_s7, %s2535_s13  ;;  %p2539_p5 = scmp.lt.u32.totalorder %s2535_s13, %s2964_s7 }
  0x4b   :  { %p2541_p6 = pnand %p2539_p5, %p2536_p4 }
  0x4d   :  { %2544 = shalt.err (!%p2541_p6)
}
  0x4e   :  { %s2545_s3 = scalar_lea.vmem %s78_s27, 8192  ;;  %p2550_p8 = scmp.lt.s32.totalorder %s78_s27, %s78_s27 }
  0x4f   :  { %p2546_p7 = scmp.ne.s32.totalorder %s78_s27, %s2545_s3  ;;  %p2551_p9 = scmp.lt.s32.totalorder %s2545_s3, %s2545_s3 }
  0x51   :  { %p2552_p10 = por %p2551_p9, %p2550_p8 }
  0x53   :  { %p2553_p11 = pnand %p2552_p10, %p2546_p7 }
  0x55   :  { %2556 = shalt.err (!%p2553_p11)
}
  0x56   :  { %83 = dma.hbm_to_vmem [thread:$0]  %s2964_s7, 8192, %s78_s27, [#allocation9], %s2612_s23, %s2612_s23, %s2613_s24  }
  0x57   :  { %s2557_s18 = scalar_lea.hbm %s2965_s8, 8192 }
  0x58   :  { %p2558_p12 = scmp.ne.s32.totalorder %s2965_s8, %s2557_s18  ;;  %p2561_p13 = scmp.lt.u32.totalorder %s2557_s18, %s2965_s8 }
  0x5a   :  { %p2563_p0 = pnand %p2561_p13, %p2558_p12 }
  0x5c   :  { %2566 = shalt.err (!%p2563_p0)
}
  0x5d   :  { %s2567_s21 = scalar_lea.vmem %s2741_s30, 8192  ;;  %p2572_p2 = scmp.lt.s32.totalorder %s2741_s30, %s2741_s30 }
  0x5e   :  { %p2568_p1 = scmp.ne.s32.totalorder %s2741_s30, %s2567_s21  ;;  %p2573_p3 = scmp.lt.s32.totalorder %s2567_s21, %s2567_s21 }
  0x60   :  { %p2574_p4 = por %p2573_p3, %p2572_p2 }
  0x62   :  { %p2575_p5 = pnand %p2574_p4, %p2568_p1 }
  0x64   :  { %2578 = shalt.err (!%p2575_p5)
}
  0x65   :  { %95 = dma.hbm_to_vmem [thread:$0]  %s2965_s8, 8192, %s2741_s30, [#allocation12], %s2612_s23, %s2612_s23, %s2613_s24  }
  0x66   :  { %2601 = dma.done.wait [#allocation3], 128  }
  0x67   :  { %2602 = vsyncadd [#allocation3], 4294967168 }
  0x68   :  { %2603 = dma.done.wait [#allocation6], 2304  }
  0x69   :  { %2604 = vsyncadd [#allocation6], 4294964992 }
  0x6a   :  { %2605 = dma.done.wait [#allocation9], 16384  }
  0x6b   :  { %2606 = vsyncadd [#allocation9], 4294950912 }
  0x6c   :  { %2607 = dma.done.wait [#allocation12], 8192  }
  0x6d   :  { %2608 = vsyncadd [#allocation12], 4294959104  ;;  %v2621_v0 = vmov 0.0|0.0   ;;  %vm2622_vm0 = vmmov 0   ;;  %v2623_v1 = vmov 0.0   ;;  %v117_v2 = vld [vmem:[#allocation5] sm:$0xff] }
  0x6e   :  { %2102 = vmatprep.subr.bf16.mxu0 %v2621_v0  ;;  %1644 = vmatprep.mubr.msk.f32.mxu0 %vm2622_vm0, %v2623_v1  ;;  %v118_v3 = vld [vmem:[#allocation5 + $0x8] sm:$0xff]  ;;  %v201_v5 = vld [vmem:[#allocation7] sm:$0xff]  ;;  %v202_v6 = vld [vmem:[#allocation7 + $0x8] sm:$0xff]  ;;  %vm126_vm1 = vcmask 130048   ;;  %s2624_s15 = smov [#allocation13]  }
  0x6f   :  { %2105 = vmatprep.subr.bf16.mxu1 %v2621_v0  ;;  %1679 = vmatprep.mubr.msk.f32.mxu1 %vm2622_vm0, %v2623_v1  ;;  %v2103_v4 = vpack.c.bf16 %v118_v3, %v117_v2  ;;  %v203_v7 = vld [vmem:[#allocation7 + $0x10] sm:$0xff]  ;;  %v2106_v8 = vpack.c.bf16 %v202_v6, %v201_v5  ;;  %v204_v9 = vld [vmem:[#allocation7 + $0x18] sm:$0xff]  ;;  %v116_v10 = vld [vmem:[#allocation2] sm:$0xff]  ;;  %s1396_s16 = sshll.u32 %s2624_s15, 4  ;;  %s1397_s16 = int_to_ptr.vmem [resolvable:$true] %s1396_s16 }
  0x70   :  { %v2109_v11 = vpack.c.bf16 %v204_v9, %v203_v7  ;;  %v205_v12 = vld [vmem:[#allocation7 + $0x20] sm:$0xff]  ;;  %v206_v13 = vld [vmem:[#allocation7 + $0x28] sm:$0xff]  ;;  %v207_v15 = vld [vmem:[#allocation7 + $0x30] sm:$0xff]  ;;  %s2579_s3 = scalar_lea.vmem %s1397_s16, 128  ;;  %p2584_p7 = scmp.lt.s32.totalorder %s1397_s16, %s1397_s16 }
  0x71   :  { %2104 = vmatpush3.bf16.msra.mxu0 %v2103_v4  ;;  %2107 = vmatpush3.bf16.msra.mxu1 %v2106_v8  ;;  %v2112_v14 = vpack.c.bf16 %v206_v13, %v205_v12  ;;  %v208_v16 = vld [vmem:[#allocation7 + $0x38] sm:$0xff]  ;;  %v209_v18 = vld [vmem:[#allocation7 + $0x40] sm:$0xff]  ;;  %v210_v19 = vld [vmem:[#allocation7 + $0x48] sm:$0xff]  ;;  %p2580_p6 = scmp.ne.s32.totalorder %s1397_s16, %s2579_s3  ;;  %p2585_p8 = scmp.lt.s32.totalorder %s2579_s3, %s2579_s3 }
  0x72   :  { %2129 = vmatprep.subr.bf16.mxu0 %v2621_v0  ;;  %2108 = vmatprep.subr.bf16.mxu1 %v2621_v0  ;;  %v2115_v17 = vpack.c.bf16 %v208_v16, %v207_v15  ;;  %v2118_v20 = vpack.c.bf16 %v210_v19, %v209_v18  ;;  %v211_v21 = vld [vmem:[#allocation7 + $0x50] sm:$0xff]  ;;  %v212_v22 = vld [vmem:[#allocation7 + $0x58] sm:$0xff]  ;;  %v213_v24 = vld [vmem:[#allocation7 + $0x60] sm:$0xff] }
  0x73   :  { %v2121_v23 = vpack.c.bf16 %v212_v22, %v211_v21  ;;  %v214_v25 = vld [vmem:[#allocation7 + $0x68] sm:$0xff]  ;;  %v215_v27 = vld [vmem:[#allocation7 + $0x70] sm:$0xff]  ;;  %v216_v28 = vld [vmem:[#allocation7 + $0x78] sm:$0xff]  ;;  %p2586_p9 = por %p2585_p8, %p2584_p7 }
  0x74   :  { %1645 = vmatmul.mubr.msk.f32.vlgmr.msra.gmra.mrb[0].mxu0 %vm126_vm1, %v116_v10  ;;  %v2124_v26 = vpack.c.bf16 %v214_v25, %v213_v24  ;;  %v2127_v29 = vpack.c.bf16 %v216_v28, %v215_v27  ;;  %v295_v30 = vld [vmem:[#allocation8] sm:$0xff]  ;;  %v1408_v51 = vld [vmem:[%s2959_s2] ss:$0 sm:$0xff] }
  0x75   :  { %1714 = vmatprep.mubr.msk.f32.mxu0 %vm2622_vm0, %v2623_v1  ;;  %2110 = vmatpush3.bf16.msra.mxu1 %v2109_v11  ;;  %v296_v31 = vld [vmem:[#allocation8 + $0x20] sm:$0xff]  ;;  %v425_v52 = vld [vmem:[#allocation8 + $0x8] sm:$0xff]  ;;  %p2587_p10 = pnand %p2586_p9, %p2580_p6 }
  0x76   :  { %2111 = vmatprep.subr.bf16.mxu1 %v2621_v0  ;;  %v2130_v32 = vpack.c.bf16 %v296_v31, %v295_v30  ;;  %v297_v33 = vld [vmem:[#allocation8 + $0x40] sm:$0xff]  ;;  %v426_v53 = vld [vmem:[#allocation8 + $0x28] sm:$0xff]  ;;  %v525_v31 = vld [vmem:[#allocation10 + $0x90] sm:$0xff] }
  0x77   :  { %v298_v34 = vld [vmem:[#allocation8 + $0x60] sm:$0xff]  ;;  %v2154_v57 = vpack.c.bf16 %v426_v53, %v425_v52  ;;  %v427_v59 = vld [vmem:[#allocation8 + $0x48] sm:$0xff] }
  0x78   :  { %2131 = vmatpush3.bf16.msra.mxu0 %v2130_v32  ;;  %v2133_v35 = vpack.c.bf16 %v298_v34, %v297_v33  ;;  %v299_v36 = vld [vmem:[#allocation8 + $0x80] sm:$0xff]  ;;  %v428_v60 = vld [vmem:[#allocation8 + $0x68] sm:$0xff]  ;;  %v526_v32 = vld [vmem:[#allocation10 + $0x98] sm:$0xff] }
  0x79   :  { %2113 = vmatpush3.bf16.msra.mxu1 %v2112_v14  ;;  %2132 = vmatprep.subr.bf16.mxu0 %v2621_v0  ;;  %v300_v37 = vld [vmem:[#allocation8 + $0xa0] sm:$0xff]  ;;  %v2157_v61 = vpack.c.bf16 %v428_v60, %v427_v59  ;;  %v429_v62 = vld [vmem:[#allocation8 + $0x88] sm:$0xff]  ;;  %v681_v34 = vld [vmem:[#allocation11 + $0x90] sm:$0xff] }
  0x7a   :  { %2114 = vmatprep.subr.bf16.mxu1 %v2621_v0  ;;  %v2136_v38 = vpack.c.bf16 %v300_v37, %v299_v36  ;;  %v301_v39 = vld [vmem:[#allocation8 + $0xc0] sm:$0xff]  ;;  %v430_v63 = vld [vmem:[#allocation8 + $0xa8] sm:$0xff]  ;;  %v2181_v36 = vpack.c.bf16 %v526_v32, %v525_v31  ;;  %v396_v31 = vld [vmem:[#allocation10 + $0x18] sm:$0xff] }
  0x7b   :  { %v302_v40 = vld [vmem:[#allocation8 + $0xe0] sm:$0xff]  ;;  %v2160_v2 = vpack.c.bf16 %v430_v63, %v429_v62  ;;  %v431_v3 = vld [vmem:[#allocation8 + $0xc8] sm:$0xff]  ;;  %v411_v32 = vld [vmem:[#allocation11 + $0x10] sm:$0xff] }
  0x7c   :  { %2134 = vmatpush3.bf16.msra.mxu0 %v2133_v35  ;;  %v2139_v41 = vpack.c.bf16 %v302_v40, %v301_v39  ;;  %v303_v42 = vld [vmem:[#allocation8 + $0x100] sm:$0xff]  ;;  %v432_v4 = vld [vmem:[#allocation8 + $0xe8] sm:$0xff]  ;;  %v682_v35 = vld [vmem:[#allocation11 + $0x98] sm:$0xff] }
  0x7d   :  { %2116 = vmatpush3.bf16.msra.mxu1 %v2115_v17  ;;  %2135 = vmatprep.subr.bf16.mxu0 %v2621_v0  ;;  %v304_v43 = vld [vmem:[#allocation8 + $0x120] sm:$0xff]  ;;  %v2163_v5 = vpack.c.bf16 %v432_v4, %v431_v3  ;;  %v433_v6 = vld [vmem:[#allocation8 + $0x108] sm:$0xff]  ;;  %v2229_v37 = vpack.c.bf16 %v682_v35, %v681_v34  ;;  %v534_v3 = vld [vmem:[#allocation10 + $0xd8] sm:$0xff] }
  0x7e   :  { %2117 = vmatprep.subr.bf16.mxu1 %v2621_v0  ;;  %v2142_v44 = vpack.c.bf16 %v304_v43, %v303_v42  ;;  %v305_v45 = vld [vmem:[#allocation8 + $0x140] sm:$0xff]  ;;  %v434_v7 = vld [vmem:[#allocation8 + $0x128] sm:$0xff]  ;;  %v689_v4 = vld [vmem:[#allocation11 + $0xd0] sm:$0xff] }
  0x7f   :  { %v306_v46 = vld [vmem:[#allocation8 + $0x160] sm:$0xff]  ;;  %v2166_v8 = vpack.c.bf16 %v434_v7, %v433_v6  ;;  %v435_v9 = vld [vmem:[#allocation8 + $0x148] sm:$0xff]  ;;  %v690_v6 = vld [vmem:[#allocation11 + $0xd8] sm:$0xff] }
  0x80   :  { %2137 = vmatpush3.bf16.msra.mxu0 %v2136_v38  ;;  %v2145_v47 = vpack.c.bf16 %v306_v46, %v305_v45  ;;  %v307_v48 = vld [vmem:[#allocation8 + $0x180] sm:$0xff]  ;;  %v436_v10 = vld [vmem:[#allocation8 + $0x168] sm:$0xff]  ;;  %v530_v45 = vld [vmem:[#allocation10 + $0xb8] sm:$0xff]  ;;  %v2241_v7 = vpack.c.bf16 %v690_v6, %v689_v4 }
  0x81   :  { %2119 = vmatpush3.bf16.msra.mxu1 %v2118_v20  ;;  %2138 = vmatprep.subr.bf16.mxu0 %v2621_v0  ;;  %v308_v49 = vld [vmem:[#allocation8 + $0x1a0] sm:$0xff]  ;;  %v2169_v11 = vpack.c.bf16 %v436_v10, %v435_v9  ;;  %v437_v12 = vld [vmem:[#allocation8 + $0x188] sm:$0xff]  ;;  %v685_v46 = vld [vmem:[#allocation11 + $0xb0] sm:$0xff] }
  0x82   :  { %2120 = vmatprep.subr.bf16.mxu1 %v2621_v0  ;;  %v2148_v50 = vpack.c.bf16 %v308_v49, %v307_v48  ;;  %v438_v13 = vld [vmem:[#allocation8 + $0x1a8] sm:$0xff]  ;;  %v309_v15 = vld [vmem:[#allocation8 + $0x1c0] sm:$0xff] }
  0x83   :  { %v2172_v14 = vpack.c.bf16 %v438_v13, %v437_v12  ;;  %v310_v16 = vld [vmem:[#allocation8 + $0x1e0] sm:$0xff]  ;;  %v439_v17 = vld [vmem:[#allocation8 + $0x1c8] sm:$0xff] }
  0x84   :  { %2140 = vmatpush3.bf16.msra.mxu0 %v2139_v41  ;;  %v2151_v18 = vpack.c.bf16 %v310_v16, %v309_v15  ;;  %v440_v19 = vld [vmem:[#allocation8 + $0x1e8] sm:$0xff]  ;;  %v679_v28 = vld [vmem:[#allocation11 + $0x80] sm:$0xff]  ;;  %v538_v15 = vld [vmem:[#allocation10 + $0xf8] sm:$0xff] }
  0x85   :  { %2122 = vmatpush3.bf16.msra.mxu1 %v2121_v23  ;;  %2141 = vmatprep.subr.bf16.mxu0 %v2621_v0  ;;  %v2175_v20 = vpack.c.bf16 %v440_v19, %v439_v17  ;;  %v1410_v21 = vld [vmem:[%s2961_s4] ss:$0 sm:$0xff]  ;;  %v527_v38 = vld [vmem:[#allocation10 + $0xa0] sm:$0xff]  ;;  %v693_v16 = vld [vmem:[#allocation11 + $0xf0] sm:$0xff] }
  0x86   :  { %2123 = vmatprep.subr.bf16.mxu1 %v2621_v0  ;;  %v524_v27 = vld [vmem:[#allocation10 + $0x88] sm:$0xff]  ;;  %v683_v40 = vld [vmem:[#allocation11 + $0xa0] sm:$0xff] }
  0x87   :  { %v680_v30 = vld [vmem:[#allocation11 + $0x88] sm:$0xff]  ;;  %v687_v52 = vld [vmem:[#allocation11 + $0xc0] sm:$0xff] }
  0x88   :  { %2143 = vmatpush3.bf16.msra.mxu0 %v2142_v44  ;;  %v2226_v33 = vpack.c.bf16 %v680_v30, %v679_v28  ;;  %v528_v39 = vld [vmem:[#allocation10 + $0xa8] sm:$0xff]  ;;  %v529_v44 = vld [vmem:[#allocation10 + $0xb0] sm:$0xff]  ;;  %v691_v10 = vld [vmem:[#allocation11 + $0xe0] sm:$0xff] }
  0x89   :  { %2125 = vmatpush3.bf16.msra.mxu1 %v2124_v26  ;;  %2144 = vmatprep.subr.bf16.mxu0 %v2621_v0  ;;  %v523_v26 = vld [vmem:[#allocation10 + $0x80] sm:$0xff]  ;;  %v684_v41 = vld [vmem:[#allocation11 + $0xa8] sm:$0xff]  ;;  %v2184_v42 = vpack.c.bf16 %v528_v39, %v527_v38  ;;  %v2187_v48 = vpack.c.bf16 %v530_v45, %v529_v44  ;;  %v395_v30 = vld [vmem:[#allocation10 + $0x10] sm:$0xff] }
  0x8a   :  { %2126 = vmatprep.subr.bf16.mxu1 %v2621_v0  ;;  %v2232_v43 = vpack.c.bf16 %v684_v41, %v683_v40  ;;  %v688_v53 = vld [vmem:[#allocation11 + $0xc8] sm:$0xff]  ;;  %v2205_v35 = vpack.c.bf16 %v396_v31, %v395_v30  ;;  %v413_v39 = vld [vmem:[#allocation11 + $0x20] sm:$0xff]  ;;  %v400_v44 = vld [vmem:[#allocation10 + $0x38] sm:$0xff] }
  0x8b   :  { %v1411_v62 = vld [vmem:[%s2963_s6] ss:$0 sm:$0xff]  ;;  %v415_v45 = vld [vmem:[#allocation11 + $0x30] sm:$0xff]  ;;  %v421_v4 = vld [vmem:[#allocation11 + $0x60] sm:$0xff] }
  0x8c   :  { %2146 = vmatpush3.bf16.msra.mxu0 %v2145_v47  ;;  %v686_v47 = vld [vmem:[#allocation11 + $0xb8] sm:$0xff]  ;;  %v536_v9 = vld [vmem:[#allocation10 + $0xe8] sm:$0xff]  ;;  %v845_v31 = vld [vmem:[#allocation8 + $0x150] sm:$0xff] }
  0x8d   :  { %2128 = vmatpush3.bf16.msra.mxu1 %v2127_v29  ;;  %2147 = vmatprep.subr.bf16.mxu0 %v2621_v0  ;;  %v2178_v29 = vpack.c.bf16 %v524_v27, %v523_v26  ;;  %v2235_v49 = vpack.c.bf16 %v686_v47, %v685_v46  ;;  %v692_v12 = vld [vmem:[#allocation11 + $0xe8] sm:$0xff]  ;;  %v409_v26 = vld [vmem:[#allocation11] sm:$0xff]  ;;  %v416_v46 = vld [vmem:[#allocation11 + $0x38] sm:$0xff] }
  0x8e   :  { %2153 = vmatprep.subr.bf16.mxu1 %v2621_v0  ;;  %v2244_v13 = vpack.c.bf16 %v692_v12, %v691_v10  ;;  %v410_v27 = vld [vmem:[#allocation11 + $0x8] sm:$0xff]  ;;  %v423_v10 = vld [vmem:[#allocation11 + $0x70] sm:$0xff] }
  0x8f   :  { %v398_v38 = vld [vmem:[#allocation10 + $0x28] sm:$0xff] }
  0x90   :  { %2149 = vmatpush3.bf16.msra.mxu0 %v2148_v50  ;;  %v531_v50 = vld [vmem:[#allocation10 + $0xc0] sm:$0xff]  ;;  %v414_v40 = vld [vmem:[#allocation11 + $0x28] sm:$0xff] }
  0x91   :  { %2150 = vmatprep.subr.bf16.mxu0 %v2621_v0 }
  0x94   :  { %2152 = vmatpush3.bf16.msra.mxu0 %v2151_v18  ;;  %v694_v18 = vld [vmem:[#allocation11 + $0xf8] sm:$0xff] }
  0x95   :  { %2177 = vmatprep.subr.bf16.mxu0 %v2621_v0  ;;  %v2247_v19 = vpack.c.bf16 %v694_v18, %v693_v16  ;;  %v838_v18 = vld [vmem:[#allocation8 + $0x70] sm:$0xff] }
 0x147   :  { %v196_v54 = vpop.f32.mrb[0].mxu0 }
 0x148   :  { %v197_v55 = vadd.f32 %v1408_v51, %v196_v54  ;;  %v1646_v56 = vpop.f32.mrb[1].mxu0  ;;  %v532_v51 = vld [vmem:[#allocation10 + $0xc8] sm:$0xff] }
 0x149   :  { %v2190_v54 = vpack.c.bf16 %v532_v51, %v531_v50  ;;  %v1412_v56 = vld [vmem:[%s2963_s6 + $0x1] ss:$0 sm:$0xff] }
 0x14a   :  { %v200_v58 = vmax.f32 %v197_v55, 0.0  ;;  %v2238_v55 = vpack.c.bf16 %v688_v53, %v687_v52  ;;  %v402_v51 = vld [vmem:[#allocation10 + $0x48] sm:$0xff]  ;;  %v417_v52 = vld [vmem:[#allocation11 + $0x40] sm:$0xff] }
 0x14b   :  { %v418_v53 = vld [vmem:[#allocation11 + $0x48] sm:$0xff] }
 0x14c   :  { %1680 = vmatmul.mubr.f32.vlgmr.msra.gmra.mrb[0].mxu1 %v200_v58 }
 0x14d   :  { %2155 = vmatpush3.bf16.msra.mxu1 %v2154_v57  ;;  %1749 = vmatprep.mubr.msk.f32.mxu1 %vm2622_vm0, %v2623_v1 }
 0x14e   :  { %2156 = vmatprep.subr.bf16.mxu1 %v2621_v0 }
 0x151   :  { %2158 = vmatpush3.bf16.msra.mxu1 %v2157_v61 }
 0x152   :  { %2159 = vmatprep.subr.bf16.mxu1 %v2621_v0 }
 0x155   :  { %2161 = vmatpush3.bf16.msra.mxu1 %v2160_v2  ;;  %v533_v2 = vld [vmem:[#allocation10 + $0xd0] sm:$0xff] }
 0x156   :  { %2162 = vmatprep.subr.bf16.mxu1 %v2621_v0 }
 0x159   :  { %2164 = vmatpush3.bf16.msra.mxu1 %v2163_v5  ;;  %v2193_v5 = vpack.c.bf16 %v534_v3, %v533_v2  ;;  %v405_v3 = vld [vmem:[#allocation10 + $0x60] sm:$0xff] }
 0x15a   :  { %2165 = vmatprep.subr.bf16.mxu1 %v2621_v0 }
 0x15d   :  { %2167 = vmatpush3.bf16.msra.mxu1 %v2166_v8  ;;  %v535_v8 = vld [vmem:[#allocation10 + $0xe0] sm:$0xff] }
 0x15e   :  { %2168 = vmatprep.subr.bf16.mxu1 %v2621_v0 }
 0x161   :  { %2170 = vmatpush3.bf16.msra.mxu1 %v2169_v11  ;;  %v2196_v11 = vpack.c.bf16 %v536_v9, %v535_v8  ;;  %v407_v8 = vld [vmem:[#allocation10 + $0x70] sm:$0xff]  ;;  %v408_v9 = vld [vmem:[#allocation10 + $0x78] sm:$0xff] }
 0x162   :  { %2171 = vmatprep.subr.bf16.mxu1 %v2621_v0  ;;  %v2223_v12 = vpack.c.bf16 %v408_v9, %v407_v8 }
 0x165   :  { %2173 = vmatpush3.bf16.msra.mxu1 %v2172_v14  ;;  %v537_v14 = vld [vmem:[#allocation10 + $0xf0] sm:$0xff] }
 0x166   :  { %2174 = vmatprep.subr.bf16.mxu1 %v2621_v0  ;;  %v2199_v17 = vpack.c.bf16 %v538_v15, %v537_v14  ;;  %v835_v14 = vld [vmem:[#allocation8 + $0x10] sm:$0xff] }
 0x167   :  { %v836_v15 = vld [vmem:[#allocation8 + $0x30] sm:$0xff] }
 0x168   :  { %v2274_v16 = vpack.c.bf16 %v836_v15, %v835_v14  ;;  %v941_v14 = vld [vmem:[#allocation10 + $0x140] sm:$0xff]  ;;  %v942_v15 = vld [vmem:[#allocation10 + $0x148] sm:$0xff] }
 0x169   :  { %2176 = vmatpush3.bf16.msra.mxu1 %v2175_v20 }
 0x16a   :  { %2225 = vmatprep.subr.bf16.mxu1 %v2621_v0 }
 0x21f   :  { %v290_v22 = vpop.f32.mrb[0].mxu1 }
 0x220   :  { %v291_v23 = vadd.f32 %v1410_v21, %v290_v22  ;;  %v1681_v24 = vpop.f32.mrb[1].mxu1 }
 0x221   :  { %v394_v24 = vld [vmem:[#allocation10 + $0x8] sm:$0xff] }
 0x222   :  { %v2819_v25 = vmax.f32 %v291_v23, 0.0  ;;  %v393_v23 = vld [vmem:[#allocation10] sm:$0xff] }
 0x223   :  { %v2202_v28 = vpack.c.bf16 %v394_v24, %v393_v23  ;;  %v841_v24 = vld [vmem:[#allocation8 + $0xd0] sm:$0xff] }
 0x224   :  { %1715 = vmatmul.mubr.f32.vlgmr.msra.gmra.mrb[2].mxu0 %v2819_v25  ;;  %1750 = vmatmul.mubr.f32.vlgmr.msra.gmra.mrb[2].mxu1 %v2819_v25 }
 0x225   :  { %1784 = vmatprep.mubr.msk.f32.mxu0 %vm2622_vm0, %v2623_v1  ;;  %1854 = vmatprep.mubr.msk.f32.mxu1 %vm2622_vm0, %v2623_v1 }
 0x226   :  { %2179 = vmatpush3.bf16.msra.mxu0 %v2178_v29  ;;  %2227 = vmatpush3.bf16.msra.mxu1 %v2226_v33  ;;  %v2250_v29 = vpack.c.bf16 %v410_v27, %v409_v26  ;;  %v412_v33 = vld [vmem:[#allocation11 + $0x18] sm:$0xff]  ;;  %v842_v26 = vld [vmem:[#allocation8 + $0xf0] sm:$0xff] }
 0x227   :  { %2180 = vmatprep.subr.bf16.mxu0 %v2621_v0  ;;  %2228 = vmatprep.subr.bf16.mxu1 %v2621_v0  ;;  %v2283_v27 = vpack.c.bf16 %v842_v26, %v841_v24  ;;  %v1033_v24 = vld [vmem:[#allocation11 + $0x168] sm:$0xff]  ;;  %v945_v26 = vld [vmem:[#allocation10 + $0x160] sm:$0xff] }
 0x22a   :  { %2182 = vmatpush3.bf16.msra.mxu0 %v2181_v36  ;;  %2230 = vmatpush3.bf16.msra.mxu1 %v2229_v37  ;;  %v2253_v36 = vpack.c.bf16 %v412_v33, %v411_v32  ;;  %v397_v37 = vld [vmem:[#allocation10 + $0x20] sm:$0xff]  ;;  %v846_v32 = vld [vmem:[#allocation8 + $0x170] sm:$0xff] }
 0x22b   :  { %2183 = vmatprep.subr.bf16.mxu0 %v2621_v0  ;;  %2231 = vmatprep.subr.bf16.mxu1 %v2621_v0  ;;  %v2208_v41 = vpack.c.bf16 %v398_v38, %v397_v37  ;;  %v2289_v33 = vpack.c.bf16 %v846_v32, %v845_v31  ;;  %v849_v37 = vld [vmem:[#allocation8 + $0x1d0] sm:$0xff] }
 0x22c   :  { %v850_v38 = vld [vmem:[#allocation8 + $0x1f0] sm:$0xff] }
 0x22d   :  { %v947_v32 = vld [vmem:[#allocation10 + $0x170] sm:$0xff] }
 0x22e   :  { %2185 = vmatpush3.bf16.msra.mxu0 %v2184_v42  ;;  %2233 = vmatpush3.bf16.msra.mxu1 %v2232_v43  ;;  %v2256_v42 = vpack.c.bf16 %v414_v40, %v413_v39  ;;  %v399_v43 = vld [vmem:[#allocation10 + $0x30] sm:$0xff]  ;;  %v2295_v39 = vpack.c.bf16 %v850_v38, %v849_v37  ;;  %v1020_v40 = vld [vmem:[#allocation11 + $0x100] sm:$0xff] }
 0x22f   :  { %2186 = vmatprep.subr.bf16.mxu0 %v2621_v0  ;;  %2234 = vmatprep.subr.bf16.mxu1 %v2621_v0  ;;  %v2211_v47 = vpack.c.bf16 %v400_v44, %v399_v43  ;;  %v934_v44 = vld [vmem:[#allocation10 + $0x108] sm:$0xff] }
 0x232   :  { %2188 = vmatpush3.bf16.msra.mxu0 %v2187_v48  ;;  %2236 = vmatpush3.bf16.msra.mxu1 %v2235_v49  ;;  %v2259_v48 = vpack.c.bf16 %v416_v46, %v415_v45  ;;  %v401_v49 = vld [vmem:[#allocation10 + $0x40] sm:$0xff]  ;;  %v1022_v45 = vld [vmem:[#allocation11 + $0x110] sm:$0xff]  ;;  %v1023_v46 = vld [vmem:[#allocation11 + $0x118] sm:$0xff] }
 0x233   :  { %2189 = vmatprep.subr.bf16.mxu0 %v2621_v0  ;;  %2237 = vmatprep.subr.bf16.mxu1 %v2621_v0 }
 0x236   :  { %2191 = vmatpush3.bf16.msra.mxu0 %v2190_v54  ;;  %2239 = vmatpush3.bf16.msra.mxu1 %v2238_v55  ;;  %v2214_v55 = vpack.c.bf16 %v402_v51, %v401_v49  ;;  %v936_v49 = vld [vmem:[#allocation10 + $0x118] sm:$0xff] }
 0x237   :  { %2192 = vmatprep.subr.bf16.mxu0 %v2621_v0  ;;  %2240 = vmatprep.subr.bf16.mxu1 %v2621_v0 }
 0x23a   :  { %2194 = vmatpush3.bf16.msra.mxu0 %v2193_v5  ;;  %2242 = vmatpush3.bf16.msra.mxu1 %v2241_v7  ;;  %v422_v5 = vld [vmem:[#allocation11 + $0x68] sm:$0xff] }
 0x23b   :  { %2195 = vmatprep.subr.bf16.mxu0 %v2621_v0  ;;  %2243 = vmatprep.subr.bf16.mxu1 %v2621_v0  ;;  %v2268_v7 = vpack.c.bf16 %v422_v5, %v421_v4 }
 0x23e   :  { %2197 = vmatpush3.bf16.msra.mxu0 %v2196_v11  ;;  %2245 = vmatpush3.bf16.msra.mxu1 %v2244_v13  ;;  %v424_v11 = vld [vmem:[#allocation11 + $0x78] sm:$0xff] }
 0x23f   :  { %2198 = vmatprep.subr.bf16.mxu0 %v2621_v0  ;;  %2246 = vmatprep.subr.bf16.mxu1 %v2621_v0  ;;  %v2271_v13 = vpack.c.bf16 %v424_v11, %v423_v10  ;;  %v1413_v10 = vld [vmem:[%s2963_s6 + $0x2] ss:$0 sm:$0xff] }
 0x242   :  { %2200 = vmatpush3.bf16.msra.mxu0 %v2199_v17  ;;  %2248 = vmatpush3.bf16.msra.mxu1 %v2247_v19  ;;  %v837_v17 = vld [vmem:[#allocation8 + $0x50] sm:$0xff] }
 0x243   :  { %2201 = vmatprep.subr.bf16.mxu0 %v2621_v0  ;;  %2249 = vmatprep.subr.bf16.mxu1 %v2621_v0 }
 0x2f7   :  { %v384_v57 = vpop.f32.mrb[2].mxu0  ;;  %v514_v58 = vpop.f32.mrb[2].mxu1 }
 0x2f8   :  { %v515_v59 = vadd.f32 %v1412_v56, %v514_v58  ;;  %v1716_v60 = vpop.f32.mrb[3].mxu0  ;;  %v1751_v61 = vpop.f32.mrb[3].mxu1  ;;  %v2843_v63 = vadd.f32 %v1411_v62, %v384_v57  ;;  %v2262_v56 = vpack.c.bf16 %v418_v53, %v417_v52  ;;  %v403_v57 = vld [vmem:[#allocation10 + $0x50] sm:$0xff]  ;;  %v404_v58 = vld [vmem:[#allocation10 + $0x58] sm:$0xff]  ;;  %v1024_v52 = vld [vmem:[#allocation11 + $0x120] sm:$0xff] }
 0x2f9   :  { %v420_v60 = vld [vmem:[#allocation11 + $0x58] sm:$0xff]  ;;  %v2217_v62 = vpack.c.bf16 %v404_v58, %v403_v57  ;;  %v1025_v53 = vld [vmem:[#allocation11 + $0x128] sm:$0xff]  ;;  %v1026_v58 = vld [vmem:[#allocation11 + $0x130] sm:$0xff] }
 0x2fa   :  { %518 = vmax.xlane.f32.xlu0 %v515_v59 }
 0x2fe   :  { %388 = vmax.xlane.f32.xlu0 %v2843_v63 }
 0x387   :  { %v519_v20 = vpop.xlane.xlu0 %518 }
 0x388   :  { %v520_v21 = vsub.f32 %v515_v59, %v519_v20  ;;  %v419_v59 = vld [vmem:[#allocation11 + $0x50] sm:$0xff]  ;;  %v2277_v20 = vpack.c.bf16 %v838_v18, %v837_v17  ;;  %v1031_v18 = vld [vmem:[#allocation11 + $0x158] sm:$0xff] }
 0x389   :  { %v2265_v2 = vpack.c.bf16 %v420_v60, %v419_v59  ;;  %v1027_v59 = vld [vmem:[#allocation11 + $0x138] sm:$0xff]  ;;  %v939_v60 = vld [vmem:[#allocation10 + $0x130] sm:$0xff] }
 0x38a   :  { %v521_v22 = vmul.f32 1.442695, %v520_v21  ;;  %v839_v21 = vld [vmem:[#allocation8 + $0x90] sm:$0xff] }
 0x38b   :  { %v389_v50 = vpop.xlane.xlu0 %388  ;;  %v1030_v17 = vld [vmem:[#allocation11 + $0x150] sm:$0xff] }
 0x38c   :  { %2437 = vpow2.f32 %v521_v22  ;;  %v390_v54 = vsub.f32 %v2843_v63, %v389_v50  ;;  %v406_v63 = vld [vmem:[#allocation10 + $0x68] sm:$0xff]  ;;  %v840_v22 = vld [vmem:[#allocation8 + $0xb0] sm:$0xff]  ;;  %v2325_v50 = vpack.c.bf16 %v1023_v46, %v1022_v45  ;;  %v1111_v46 = vld [vmem:[#allocation8 + $0x98] sm:$0xff] }
 0x38d   :  { %v2220_v6 = vpack.c.bf16 %v406_v63, %v405_v3  ;;  %v2280_v23 = vpack.c.bf16 %v840_v22, %v839_v21  ;;  %v1028_v3 = vld [vmem:[#allocation11 + $0x140] sm:$0xff]  ;;  %v1029_v63 = vld [vmem:[#allocation11 + $0x148] sm:$0xff]  ;;  %v944_v21 = vld [vmem:[#allocation10 + $0x158] sm:$0xff] }
 0x38e   :  { %v391_v61 = vmul.f32 1.442695, %v390_v54  ;;  %v937_v54 = vld [vmem:[#allocation10 + $0x120] sm:$0xff]  ;;  %v2334_v4 = vpack.c.bf16 %v1029_v63, %v1028_v3  ;;  %v1206_v63 = vld [vmem:[#allocation10 + $0x188] sm:$0xff] }
 0x38f   :  { %v1205_v3 = vld [vmem:[#allocation10 + $0x180] sm:$0xff] }
 0x390   :  { %2439 = vpow2.f32 %v391_v61  ;;  %v940_v61 = vld [vmem:[#allocation10 + $0x138] sm:$0xff] }
 0x396   :  { %v2438_v34 = vpop.eup %2437 }
 0x397   :  { %1785 = vmatmul.mubr.f32.vlgmr.msra.gmra.mrb[4].mxu0 %v2438_v34  ;;  %1855 = vmatmul.mubr.f32.vlgmr.msra.gmra.mrb[4].mxu1 %v2438_v34  ;;  %v847_v34 = vld [vmem:[#allocation8 + $0x190] sm:$0xff] }
 0x398   :  { %2203 = vmatpush3.bf16.msra.mxu0 %v2202_v28  ;;  %2251 = vmatpush3.bf16.msra.mxu1 %v2250_v29  ;;  %v843_v28 = vld [vmem:[#allocation8 + $0x110] sm:$0xff] }
 0x399   :  { %2204 = vmatprep.subr.bf16.mxu0 %v2621_v0  ;;  %2252 = vmatprep.subr.bf16.mxu1 %v2621_v0  ;;  %v844_v29 = vld [vmem:[#allocation8 + $0x130] sm:$0xff] }
 0x39a   :  { %1819 = vmatprep.mubr.msk.f32.mxu0 %vm2622_vm0, %v2623_v1  ;;  %1889 = vmatprep.mubr.msk.f32.mxu1 %vm2622_vm0, %v2623_v1  ;;  %v2440_v19 = vpop.eup %2439  ;;  %v2286_v30 = vpack.c.bf16 %v844_v29, %v843_v28  ;;  %v946_v28 = vld [vmem:[#allocation10 + $0x168] sm:$0xff]  ;;  %v1034_v29 = vld [vmem:[#allocation11 + $0x170] sm:$0xff] }
 0x39b   :  { %v2316_v31 = vpack.c.bf16 %v946_v28, %v945_v26 }
 0x39c   :  { %2206 = vmatpush3.bf16.msra.mxu0 %v2205_v35  ;;  %2254 = vmatpush3.bf16.msra.mxu1 %v2253_v36  ;;  %v848_v35 = vld [vmem:[#allocation8 + $0x1b0] sm:$0xff] }
 0x39d   :  { %2207 = vmatprep.subr.bf16.mxu0 %v2621_v0  ;;  %2255 = vmatprep.subr.bf16.mxu1 %v2621_v0  ;;  %v2292_v36 = vpack.c.bf16 %v848_v35, %v847_v34 }
 0x3a0   :  { %2209 = vmatpush3.bf16.msra.mxu0 %v2208_v41  ;;  %2257 = vmatpush3.bf16.msra.mxu1 %v2256_v42  ;;  %v1021_v41 = vld [vmem:[#allocation11 + $0x108] sm:$0xff]  ;;  %v933_v42 = vld [vmem:[#allocation10 + $0x100] sm:$0xff] }
 0x3a1   :  { %2210 = vmatprep.subr.bf16.mxu0 %v2621_v0  ;;  %2258 = vmatprep.subr.bf16.mxu1 %v2621_v0  ;;  %v2322_v43 = vpack.c.bf16 %v1021_v41, %v1020_v40  ;;  %v1108_v40 = vld [vmem:[#allocation8 + $0x38] sm:$0xff] }
 0x3a4   :  { %2212 = vmatpush3.bf16.msra.mxu0 %v2211_v47  ;;  %2260 = vmatpush3.bf16.msra.mxu1 %v2259_v48  ;;  %v2298_v47 = vpack.c.bf16 %v934_v44, %v933_v42  ;;  %v935_v48 = vld [vmem:[#allocation10 + $0x110] sm:$0xff]  ;;  %v1109_v42 = vld [vmem:[#allocation8 + $0x58] sm:$0xff] }
 0x3a5   :  { %2213 = vmatprep.subr.bf16.mxu0 %v2621_v0  ;;  %2261 = vmatprep.subr.bf16.mxu1 %v2621_v0  ;;  %v2301_v51 = vpack.c.bf16 %v936_v49, %v935_v48  ;;  %v1113_v49 = vld [vmem:[#allocation8 + $0xd8] sm:$0xff] }
 0x3a8   :  { %2215 = vmatpush3.bf16.msra.mxu0 %v2214_v55  ;;  %2263 = vmatpush3.bf16.msra.mxu1 %v2262_v56  ;;  %v938_v55 = vld [vmem:[#allocation10 + $0x128] sm:$0xff]  ;;  %v2328_v56 = vpack.c.bf16 %v1025_v53, %v1024_v52  ;;  %v1115_v52 = vld [vmem:[#allocation8 + $0x118] sm:$0xff] }
 0x3a9   :  { %2216 = vmatprep.subr.bf16.mxu0 %v2621_v0  ;;  %2264 = vmatprep.subr.bf16.mxu1 %v2621_v0  ;;  %v2304_v57 = vpack.c.bf16 %v938_v55, %v937_v54  ;;  %v1116_v53 = vld [vmem:[#allocation8 + $0x138] sm:$0xff] }
 0x3aa   :  { %v2358_v54 = vpack.c.bf16 %v1116_v53, %v1115_v52  ;;  %v1117_v55 = vld [vmem:[#allocation8 + $0x158] sm:$0xff]  ;;  %v1306_v52 = vld [vmem:[#allocation11 + $0x1f0] sm:$0xff] }
 0x3ab   :  { %v1307_v53 = vld [vmem:[#allocation11 + $0x1f8] sm:$0xff] }
 0x3ac   :  { %2218 = vmatpush3.bf16.msra.mxu0 %v2217_v62  ;;  %2266 = vmatpush3.bf16.msra.mxu1 %v2265_v2  ;;  %v2331_v62 = vpack.c.bf16 %v1027_v59, %v1026_v58  ;;  %v2307_v2 = vpack.c.bf16 %v940_v61, %v939_v60  ;;  %v1119_v58 = vld [vmem:[#allocation8 + $0x198] sm:$0xff] }
 0x3ad   :  { %2219 = vmatprep.subr.bf16.mxu0 %v2621_v0  ;;  %2267 = vmatprep.subr.bf16.mxu1 %v2621_v0  ;;  %v1120_v59 = vld [vmem:[#allocation8 + $0x1b8] sm:$0xff] }
 0x3ae   :  { %v2364_v60 = vpack.c.bf16 %v1120_v59, %v1119_v58  ;;  %v1121_v61 = vld [vmem:[#allocation8 + $0x1d8] sm:$0xff] }
 0x3b0   :  { %2221 = vmatpush3.bf16.msra.mxu0 %v2220_v6  ;;  %2269 = vmatpush3.bf16.msra.mxu1 %v2268_v7 }
 0x3b1   :  { %2222 = vmatprep.subr.bf16.mxu0 %v2621_v0  ;;  %2270 = vmatprep.subr.bf16.mxu1 %v2621_v0 }
 0x3b4   :  { %2224 = vmatpush3.bf16.msra.mxu0 %v2223_v12  ;;  %2272 = vmatpush3.bf16.msra.mxu1 %v2271_v13 }
 0x3b5   :  { %2273 = vmatprep.subr.bf16.mxu0 %v2621_v0  ;;  %2321 = vmatprep.subr.bf16.mxu1 %v2621_v0 }
 0x3b7   :  { %1820 = vmatmul.mubr.f32.vlgmr.msra.gmra.mrb[4].mxu0 %v2440_v19  ;;  %1890 = vmatmul.mubr.f32.vlgmr.msra.gmra.mrb[6].mxu1 %v2440_v19  ;;  %v2337_v19 = vpack.c.bf16 %v1031_v18, %v1030_v17 }
 0x3b8   :  { %2275 = vmatpush3.bf16.msra.mxu0 %v2274_v16  ;;  %1924 = vmatprep.mubr.msk.f32.mxu0 %vm2622_vm0, %v2623_v1  ;;  %v2310_v16 = vpack.c.bf16 %v942_v15, %v941_v14  ;;  %v1210_v15 = vld [vmem:[#allocation10 + $0x1a8] sm:$0xff] }
 0x3b9   :  { %2276 = vmatprep.subr.bf16.mxu0 %v2621_v0  ;;  %1994 = vmatprep.mubr.msk.f32.mxu1 %vm2622_vm0, %v2623_v1 }
 0x3ba   :  { %2323 = vmatpush3.bf16.msra.mxu1 %v2322_v43  ;;  %v1110_v43 = vld [vmem:[#allocation8 + $0x78] sm:$0xff] }
 0x3bb   :  { %2324 = vmatprep.subr.bf16.mxu1 %v2621_v0  ;;  %v2349_v45 = vpack.c.bf16 %v1110_v43, %v1109_v42  ;;  %v1303_v42 = vld [vmem:[#allocation11 + $0x1d8] sm:$0xff] }
 0x3bc   :  { %2278 = vmatpush3.bf16.msra.mxu0 %v2277_v20  ;;  %v943_v20 = vld [vmem:[#allocation10 + $0x150] sm:$0xff] }
 0x3bd   :  { %2279 = vmatprep.subr.bf16.mxu0 %v2621_v0  ;;  %v2313_v22 = vpack.c.bf16 %v944_v21, %v943_v20  ;;  %v1212_v20 = vld [vmem:[#allocation10 + $0x1b8] sm:$0xff]  ;;  %v1298_v21 = vld [vmem:[#allocation11 + $0x1b0] sm:$0xff] }
 0x3be   :  { %2326 = vmatpush3.bf16.msra.mxu1 %v2325_v50  ;;  %v1114_v50 = vld [vmem:[#allocation8 + $0xf8] sm:$0xff] }
 0x3bf   :  { %2327 = vmatprep.subr.bf16.mxu1 %v2621_v0 }
 0x3c0   :  { %2281 = vmatpush3.bf16.msra.mxu0 %v2280_v23  ;;  %v1032_v23 = vld [vmem:[#allocation11 + $0x160] sm:$0xff] }
 0x3c1   :  { %2282 = vmatprep.subr.bf16.mxu0 %v2621_v0 }
 0x3c2   :  { %2329 = vmatpush3.bf16.msra.mxu1 %v2328_v56  ;;  %v1118_v56 = vld [vmem:[#allocation8 + $0x178] sm:$0xff] }
 0x3c3   :  { %2330 = vmatprep.subr.bf16.mxu1 %v2621_v0 }
 0x3c4   :  { %2284 = vmatpush3.bf16.msra.mxu0 %v2283_v27  ;;  %v2340_v27 = vpack.c.bf16 %v1033_v24, %v1032_v23 }
 0x3c5   :  { %2285 = vmatprep.subr.bf16.mxu0 %v2621_v0 }
 0x3c6   :  { %2332 = vmatpush3.bf16.msra.mxu1 %v2331_v62  ;;  %v1122_v62 = vld [vmem:[#allocation8 + $0x1f8] sm:$0xff] }
 0x3c7   :  { %2333 = vmatprep.subr.bf16.mxu1 %v2621_v0 }
 0x3c8   :  { %2287 = vmatpush3.bf16.msra.mxu0 %v2286_v30  ;;  %v1035_v30 = vld [vmem:[#allocation11 + $0x178] sm:$0xff] }
 0x3c9   :  { %2288 = vmatprep.subr.bf16.mxu0 %v2621_v0  ;;  %v2343_v34 = vpack.c.bf16 %v1035_v30, %v1034_v29  ;;  %v1414_v29 = vld [vmem:[%s2963_s6 + $0x3] ss:$0 sm:$0xff] }
 0x3ca   :  { %2335 = vmatpush3.bf16.msra.mxu1 %v2334_v4  ;;  %v1292_v4 = vld [vmem:[#allocation11 + $0x180] sm:$0xff] }
 0x3cb   :  { %2336 = vmatprep.subr.bf16.mxu1 %v2621_v0 }
 0x3cc   :  { %2290 = vmatpush3.bf16.msra.mxu0 %v2289_v33  ;;  %v948_v33 = vld [vmem:[#allocation10 + $0x178] sm:$0xff] }
 0x3cd   :  { %2291 = vmatprep.subr.bf16.mxu0 %v2621_v0  ;;  %v2319_v35 = vpack.c.bf16 %v948_v33, %v947_v32  ;;  %v1213_v33 = vld [vmem:[#allocation10 + $0x1c0] sm:$0xff] }
 0x3ce   :  { %2338 = vmatpush3.bf16.msra.mxu1 %v2337_v19  ;;  %v1211_v19 = vld [vmem:[#allocation10 + $0x1b0] sm:$0xff] }
 0x3cf   :  { %2339 = vmatprep.subr.bf16.mxu1 %v2621_v0  ;;  %v2379_v23 = vpack.c.bf16 %v1212_v20, %v1211_v19 }
 0x3d0   :  { %2293 = vmatpush3.bf16.msra.mxu0 %v2292_v36 }
 0x3d1   :  { %2294 = vmatprep.subr.bf16.mxu0 %v2621_v0 }
 0x3d2   :  { %2341 = vmatpush3.bf16.msra.mxu1 %v2340_v27 }
 0x3d3   :  { %2342 = vmatprep.subr.bf16.mxu1 %v2621_v0 }
 0x3d4   :  { %2296 = vmatpush3.bf16.msra.mxu0 %v2295_v39  ;;  %v1107_v39 = vld [vmem:[#allocation8 + $0x18] sm:$0xff] }
 0x3d5   :  { %2297 = vmatprep.subr.bf16.mxu0 %v2621_v0  ;;  %v2346_v41 = vpack.c.bf16 %v1108_v40, %v1107_v39  ;;  %v1216_v39 = vld [vmem:[#allocation10 + $0x1d8] sm:$0xff]  ;;  %v1302_v40 = vld [vmem:[#allocation11 + $0x1d0] sm:$0xff] }
 0x3d6   :  { %2344 = vmatpush3.bf16.msra.mxu1 %v2343_v34  ;;  %v1214_v34 = vld [vmem:[#allocation10 + $0x1c8] sm:$0xff]  ;;  %v2409_v43 = vpack.c.bf16 %v1303_v42, %v1302_v40 }
 0x3d7   :  { %1925 = vmatmul.mubr.f32.vlgmr.msra.gmra.mrb[6].mxu0 %v2819_v25  ;;  %2345 = vmatprep.subr.bf16.mxu1 %v2621_v0 }
 0x3d8   :  { %1959 = vmatprep.mubr.msk.f32.mxu0 %vm2622_vm0, %v2623_v1  ;;  %2299 = vmatpush3.bf16.msra.mxu0 %v2298_v47  ;;  %v1112_v47 = vld [vmem:[#allocation8 + $0xb8] sm:$0xff] }
 0x3d9   :  { %2300 = vmatprep.subr.bf16.mxu0 %v2621_v0  ;;  %v2352_v48 = vpack.c.bf16 %v1112_v47, %v1111_v46  ;;  %v1304_v46 = vld [vmem:[#allocation11 + $0x1e0] sm:$0xff] }
 0x3dc   :  { %2302 = vmatpush3.bf16.msra.mxu0 %v2301_v51  ;;  %v2355_v51 = vpack.c.bf16 %v1114_v50, %v1113_v49  ;;  %v1219_v49 = vld [vmem:[#allocation10 + $0x1f0] sm:$0xff]  ;;  %v1220_v50 = vld [vmem:[#allocation10 + $0x1f8] sm:$0xff] }
 0x3dd   :  { %2303 = vmatprep.subr.bf16.mxu0 %v2621_v0 }
 0x3e0   :  { %2305 = vmatpush3.bf16.msra.mxu0 %v2304_v57  ;;  %v2361_v57 = vpack.c.bf16 %v1118_v56, %v1117_v55  ;;  %v2415_v55 = vpack.c.bf16 %v1307_v53, %v1306_v52 }
 0x3e1   :  { %2306 = vmatprep.subr.bf16.mxu0 %v2621_v0 }
 0x3e4   :  { %2308 = vmatpush3.bf16.msra.mxu0 %v2307_v2  ;;  %v2367_v2 = vpack.c.bf16 %v1122_v62, %v1121_v61  ;;  %v1415_v62 = vld [vmem:[%s2966_s9] ss:$0 sm:$0xff] }
 0x3e5   :  { %2309 = vmatprep.subr.bf16.mxu0 %v2621_v0 }
 0x3e8   :  { %2311 = vmatpush3.bf16.msra.mxu0 %v2310_v16  ;;  %v1297_v16 = vld [vmem:[#allocation11 + $0x1a8] sm:$0xff] }
 0x3e9   :  { %2312 = vmatprep.subr.bf16.mxu0 %v2621_v0 }
 0x3ec   :  { %2314 = vmatpush3.bf16.msra.mxu0 %v2313_v22  ;;  %v1299_v22 = vld [vmem:[#allocation11 + $0x1b8] sm:$0xff] }
 0x3ed   :  { %2315 = vmatprep.subr.bf16.mxu0 %v2621_v0  ;;  %v2403_v24 = vpack.c.bf16 %v1299_v22, %v1298_v21 }
 0x3f0   :  { %2317 = vmatpush3.bf16.msra.mxu0 %v2316_v31 }
 0x3f1   :  { %2318 = vmatprep.subr.bf16.mxu0 %v2621_v0 }
 0x3f4   :  { %2320 = vmatpush3.bf16.msra.mxu0 %v2319_v35  ;;  %v1300_v35 = vld [vmem:[#allocation11 + $0x1c0] sm:$0xff] }
 0x3f5   :  { %2369 = vmatprep.subr.bf16.mxu0 %v2621_v0 }
 0x46a   :  { %v761_v5 = vpop.f32.mrb[4].mxu1 }
 0x46b   :  { %v1856_v6 = vpop.f32.mrb[5].mxu1 }
 0x46c   :  { %v1293_v6 = vld [vmem:[#allocation11 + $0x188] sm:$0xff] }
 0x48a   :  { %v831_v7 = vpop.f32.mrb[6].mxu1 }
 0x48b   :  { %v2897_v8 = vadd.f32 %v831_v7, %v761_v5  ;;  %v1891_v9 = vpop.f32.mrb[7].mxu1  ;;  %v2370_v5 = vpack.c.bf16 %v1206_v63, %v1205_v3  ;;  %v1207_v7 = vld [vmem:[#allocation10 + $0x190] sm:$0xff] }
 0x48c   :  { %v1208_v9 = vld [vmem:[#allocation10 + $0x198] sm:$0xff] }
 0x4aa   :  { %v924_v11 = vpop.f32.mrb[6].mxu0 }
 0x4ab   :  { %v925_v12 = vadd.f32 %v1413_v10, %v924_v11  ;;  %v1926_v13 = vpop.f32.mrb[7].mxu0  ;;  %v2394_v10 = vpack.c.bf16 %v1293_v6, %v1292_v4  ;;  %v1294_v11 = vld [vmem:[#allocation11 + $0x190] sm:$0xff] }
 0x4ac   :  { %v2373_v13 = vpack.c.bf16 %v1208_v9, %v1207_v7 }
 0x4ad   :  { %928 = vmax.xlane.f32.xlu1 %v925_v12 }
 0x53a   :  { %v929_v36 = vpop.xlane.xlu1 %928 }
 0x53b   :  { %v930_v37 = vsub.f32 %v925_v12, %v929_v36  ;;  %v1295_v12 = vld [vmem:[#allocation11 + $0x198] sm:$0xff]  ;;  %v2382_v36 = vpack.c.bf16 %v1214_v34, %v1213_v33 }
 0x53c   :  { %v2397_v14 = vpack.c.bf16 %v1295_v12, %v1294_v11 }
 0x53d   :  { %v931_v38 = vmul.f32 1.442695, %v930_v37  ;;  %v1301_v37 = vld [vmem:[#allocation11 + $0x1c8] sm:$0xff] }
 0x53f   :  { %2441 = vpow2.f32 %v931_v38  ;;  %v2406_v38 = vpack.c.bf16 %v1301_v37, %v1300_v35 }
 0x549   :  { %v2442_v44 = vpop.eup %2441 }
 0x54a   :  { %1960 = vmatmul.mubr.f32.vlgmr.msra.gmra.mrb[4].mxu0 %v2442_v44  ;;  %1995 = vmatmul.mubr.f32.vlgmr.msra.gmra.mrb[8].mxu1 %v2442_v44  ;;  %v1217_v44 = vld [vmem:[#allocation10 + $0x1e0] sm:$0xff] }
 0x54b   :  { %2347 = vmatpush3.bf16.msra.mxu1 %v2346_v41  ;;  %2029 = vmatprep.mubr.msk.f32.mxu1 %vm2622_vm0, %v2623_v1 }
 0x54c   :  { %2348 = vmatprep.subr.bf16.mxu1 %v2621_v0  ;;  %2064 = vmatprep.mubr.msk.f32.mxu0 %vm2622_vm0, %v2623_v1 }
 0x54d   :  { %2371 = vmatpush3.bf16.msra.mxu0 %v2370_v5 }
 0x54e   :  { %2372 = vmatprep.subr.bf16.mxu0 %v2621_v0 }
 0x54f   :  { %2350 = vmatpush3.bf16.msra.mxu1 %v2349_v45  ;;  %v1218_v45 = vld [vmem:[#allocation10 + $0x1e8] sm:$0xff] }
 0x550   :  { %2351 = vmatprep.subr.bf16.mxu1 %v2621_v0  ;;  %v2388_v47 = vpack.c.bf16 %v1218_v45, %v1217_v44 }
 0x551   :  { %2374 = vmatpush3.bf16.msra.mxu0 %v2373_v13 }
 0x552   :  { %2375 = vmatprep.subr.bf16.mxu0 %v2621_v0 }
 0x553   :  { %2353 = vmatpush3.bf16.msra.mxu1 %v2352_v48  ;;  %v1305_v48 = vld [vmem:[#allocation11 + $0x1e8] sm:$0xff] }
 0x554   :  { %2354 = vmatprep.subr.bf16.mxu1 %v2621_v0 }
 0x557   :  { %2356 = vmatpush3.bf16.msra.mxu1 %v2355_v51  ;;  %v2412_v51 = vpack.c.bf16 %v1305_v48, %v1304_v46 }
 0x558   :  { %2357 = vmatprep.subr.bf16.mxu1 %v2621_v0 }
 0x55b   :  { %2359 = vmatpush3.bf16.msra.mxu1 %v2358_v54  ;;  %v2391_v54 = vpack.c.bf16 %v1220_v50, %v1219_v49 }
 0x55c   :  { %2360 = vmatprep.subr.bf16.mxu1 %v2621_v0 }
 0x55f   :  { %2362 = vmatpush3.bf16.msra.mxu1 %v2361_v57 }
 0x560   :  { %2363 = vmatprep.subr.bf16.mxu1 %v2621_v0 }
 0x563   :  { %2365 = vmatpush3.bf16.msra.mxu1 %v2364_v60 }
 0x564   :  { %2366 = vmatprep.subr.bf16.mxu1 %v2621_v0 }
 0x567   :  { %2368 = vmatpush3.bf16.msra.mxu1 %v2367_v2 }
 0x568   :  { %2393 = vmatprep.subr.bf16.mxu1 %v2621_v0 }
 0x56a   :  { %2030 = vmatmul.mubr.f32.vlgmr.msra.gmra.mrb[10].mxu1 %v2819_v25  ;;  %v1209_v25 = vld [vmem:[#allocation10 + $0x1a0] sm:$0xff] }
 0x56b   :  { %2099 = vmatprep.mubr.msk.f32.mxu1 %vm2622_vm0, %v2623_v1  ;;  %2395 = vmatpush3.bf16.msra.mxu1 %v2394_v10  ;;  %v1296_v1 = vld [vmem:[#allocation11 + $0x1a0] sm:$0xff]  ;;  %v2376_v17 = vpack.c.bf16 %v1210_v15, %v1209_v25 }
 0x56c   :  { %2396 = vmatprep.subr.bf16.mxu1 %v2621_v0  ;;  %v2400_v18 = vpack.c.bf16 %v1297_v16, %v1296_v1 }
 0x56d   :  { %2377 = vmatpush3.bf16.msra.mxu0 %v2376_v17 }
 0x56e   :  { %2378 = vmatprep.subr.bf16.mxu0 %v2621_v0 }
 0x56f   :  { %2398 = vmatpush3.bf16.msra.mxu1 %v2397_v14 }
 0x570   :  { %2399 = vmatprep.subr.bf16.mxu1 %v2621_v0 }
 0x571   :  { %2380 = vmatpush3.bf16.msra.mxu0 %v2379_v23 }
 0x572   :  { %2381 = vmatprep.subr.bf16.mxu0 %v2621_v0 }
 0x573   :  { %2401 = vmatpush3.bf16.msra.mxu1 %v2400_v18 }
 0x574   :  { %2402 = vmatprep.subr.bf16.mxu1 %v2621_v0 }
 0x575   :  { %2383 = vmatpush3.bf16.msra.mxu0 %v2382_v36 }
 0x576   :  { %2384 = vmatprep.subr.bf16.mxu0 %v2621_v0 }
 0x577   :  { %2404 = vmatpush3.bf16.msra.mxu1 %v2403_v24 }
 0x578   :  { %2405 = vmatprep.subr.bf16.mxu1 %v2621_v0 }
 0x57b   :  { %2407 = vmatpush3.bf16.msra.mxu1 %v2406_v38 }
 0x57c   :  { %2408 = vmatprep.subr.bf16.mxu1 %v2621_v0 }
 0x57f   :  { %2410 = vmatpush3.bf16.msra.mxu1 %v2409_v43 }
 0x580   :  { %2411 = vmatprep.subr.bf16.mxu1 %v2621_v0 }
 0x583   :  { %2413 = vmatpush3.bf16.msra.mxu1 %v2412_v51 }
 0x584   :  { %2414 = vmatprep.subr.bf16.mxu1 %v2621_v0 }
 0x587   :  { %2416 = vmatpush3.bf16.msra.mxu1 %v2415_v55 }
 0x61d   :  { %v1102_v26 = vpop.f32.mrb[8].mxu1 }
 0x61e   :  { %v1106_v27 = vadd.f32 %v1102_v26, %v2897_v8  ;;  %v1996_v28 = vpop.f32.mrb[9].mxu1  ;;  %v1215_v8 = vld [vmem:[#allocation10 + $0x1d0] sm:$0xff] }
 0x61f   :  { %v2385_v41 = vpack.c.bf16 %v1216_v39, %v1215_v8 }
 0x621   :  { %2386 = vmatpush3.bf16.msra.mxu0 %v2385_v41 }
 0x622   :  { %2387 = vmatprep.subr.bf16.mxu0 %v2621_v0 }
 0x625   :  { %2389 = vmatpush3.bf16.msra.mxu0 %v2388_v47 }
 0x626   :  { %2390 = vmatprep.subr.bf16.mxu0 %v2621_v0 }
 0x629   :  { %2392 = vmatpush3.bf16.msra.mxu0 %v2391_v54 }
 0x63d   :  { %v1196_v30 = vpop.f32.mrb[10].mxu1 }
 0x63e   :  { %v1197_v31 = vadd.f32 %v1414_v29, %v1196_v30  ;;  %v2031_v32 = vpop.f32.mrb[11].mxu1 }
 0x640   :  { %1200 = vmax.xlane.f32.xlu1 %v1197_v31 }
 0x6cd   :  { %v1201_v56 = vpop.xlane.xlu1 %1200 }
 0x6ce   :  { %v1202_v57 = vsub.f32 %v1197_v31, %v1201_v56 }
 0x6d0   :  { %v1203_v58 = vmul.f32 1.442695, %v1202_v57 }
 0x6d2   :  { %2443 = vpow2.f32 %v1203_v58 }
 0x6dc   :  { %v2444_v59 = vpop.eup %2443 }
 0x6dd   :  { %2065 = vmatmul.mubr.f32.vlgmr.msra.gmra.mrb[4].mxu0 %v2444_v59  ;;  %2100 = vmatmul.mubr.f32.vlgmr.msra.gmra.mrb[12].mxu1 %v2444_v59 }
 0x7b0   :  { %v1287_v60 = vpop.f32.mrb[4].mxu0  ;;  %v1374_v61 = vpop.f32.mrb[12].mxu1 }
 0x7b1   :  { %v1378_v2 = vadd.f32 %v1374_v61, %v1106_v27  ;;  %v2066_v3 = vpop.f32.mrb[5].mxu0  ;;  %v2101_v63 = vpop.f32.mrb[13].mxu1 }
 0x7b3   :  { %v1386_v4 = vadd.f32 %v1415_v62, %v1378_v2 }
 0x7b5   :  { %2445 = vrcp.f32 %v1386_v4 }
 0x7bf   :  { %v2446_v0 = vpop.eup %2445 }
 0x7c0   :  { %v1388_v5 = vmul.f32 %v2446_v0, %v1287_v60 }
 0x7c2   :  { %1389 = vst [vmem:[#allocation13] sm:$0xff] %v1388_v5 }
 0x7c3   :  { %2590 = shalt.err (!%p2587_p10)
}
 0x7c4   :  { %s2591_s17 = scalar_lea.hbm %s2967_s10, 128 }
 0x7c5   :  { %p2592_p11 = scmp.ne.s32.totalorder %s2967_s10, %s2591_s17  ;;  %p2595_p12 = scmp.lt.u32.totalorder %s2591_s17, %s2967_s10 }
 0x7c7   :  { %p2597_p13 = pnand %p2595_p12, %p2592_p11 }
 0x7c9   :  { %2600 = shalt.err (!%p2597_p13)
}
 0x7ca   :  { %1399 = dma.vmem_to_hbm [thread:$0]  %s1397_s16, 128, %s2967_s10, [#allocation4]  }
 0x7cb   :  { %2609 = dma.done.wait [#allocation4], 128  }
 0x7cc   :  { %2610 = vsyncadd [#allocation4], 4294967168 }
 0x7cd   :  { %1403 = vsyncpa [#allocation3], 1 }
 0x7ce   :  { %1404 = vsyncpa [#allocation6], 1 }
 0x7cf   :  { %1405 = vsyncpa [#allocation9], 1 }
 0x7d0   :  { %1406 = vsyncpa [#allocation12], 1 }
 0x7d1   :  { %1407 = vsyncpa [#allocation4], 1 }

</bundles_post_ra>
